<compile_context>
chip_gen: v6e
topology: v6e:2x2x1
jax: 0.10.0
libtpu: 0.0.40
codegen_flags: <defaults>
</compile_context>

<pallas_src>
import jax
import jax.numpy as jnp
from jax.experimental import pallas as pl
from jax.experimental.pallas import tpu as pltpu

# ---------------- synthetic encoder config (small shapes) ----------------
B = 2            # batch
S = 8            # sequence length
H = 32           # hidden size
NH = 2           # attention heads
HD = H // NH     # head dim
FF = 64          # FFN intermediate size
L = 2            # transformer layers
VOCAB = 100
TYPE_VOCAB = 2
EPS = 1e-12      # BERT layernorm eps
SCALE = 1.0 / (HD ** 0.5)

GB = 2 * B       # sequences per grid step (tail+head stacked; hr step is padded)
ROWS = GB * S    # token rows per grid step
NSTEP = 2        # grid: step 0 -> hr_bert branch, step 1 -> tail_bert (tail + head)


# ---------------------------- Pallas kernel --------------------------------
def _ln(x, gamma, beta):
    mu = jnp.mean(x, axis=-1, keepdims=True)
    var = jnp.mean(jnp.square(x - mu), axis=-1, keepdims=True)
    return (x - mu) * jax.lax.rsqrt(var + EPS) * gamma + beta


def _fused_encoder_kernel(emb_ref, bias_ref, pool_ref, gb_ref,
                          wqkv_ref, bqkv_ref, wo_ref, w1_ref, w2_ref, vslab_ref,
                          out_ref):
    # One grid step = one encoder (hr_bert or tail_bert) applied to GB
    # row-stacked sequences, then masked mean-pool + L2 normalize.
    gb = gb_ref[0]                                       # (2, H): [gamma ; beta]
    x = _ln(emb_ref[0], gb[0:1, :], gb[1:2, :])          # (ROWS, H) embedding LN

    bias3 = bias_ref[0][:, None, :]                      # (GB, 1, S) hoisted key-mask bias

    for l in range(L):                                   # static layer loop (L = 2)
        wqkv = wqkv_ref[0, l]                            # (H, 3H) = [wq*SCALE | wk | wv]
        bqkv = bqkv_ref[0, l]                            # (1, 3H)
        wo = wo_ref[0, l]                                # (H, H)
        vs = vslab_ref[0, l]                             # (8, FF) row-packed vec params
        # rows of vs: 0 bo | 1 g1 | 2 be1 | 3 b2 | 4 g2 | 5 be2 | 6 b1 | 7 pad

        # fused QKV: one (ROWS, H) x (H, 3H) matmul (SCALE already folded in)
        qkv = jnp.dot(x, wqkv, preferred_element_type=jnp.float32) + bqkv

        attn_out = vs[0:1, :H]                           # bo; heads accumulate below
        for h in range(NH):                              # static head loop (NH = 2)
            c0 = h * HD
            qh = qkv[:, c0:c0 + HD].reshape(GB, S, HD)
            kh = qkv[:, H + c0:H + c0 + HD].reshape(GB, S, HD)
            vh = qkv[:, 2 * H + c0:2 * H + c0 + HD].reshape(GB, S, HD)
            # batched over the GB sequences -> no per-batch loop / concatenates
            s = jnp.einsum('bqd,bkd->bqk', qh, kh,
                           preferred_element_type=jnp.float32) + bias3
            s = s - jnp.max(s, axis=-1, keepdims=True)
            e = jnp.exp(s)
            p = e * pl.reciprocal(jnp.sum(e, axis=-1, keepdims=True), approx=True)
            ctx = jnp.einsum('bqk,bkd->bqd', p, vh,
                             preferred_element_type=jnp.float32)
            # per-head output projection (row block of wo) -> no lane concat of heads
            attn_out = attn_out + jnp.dot(ctx.reshape(ROWS, HD), wo[c0:c0 + HD, :],
                                          preferred_element_type=jnp.float32)

        x1 = _ln(x + attn_out, vs[1:2, :H], vs[2:3, :H])

        hmid = jnp.dot(x1, w1_ref[0, l], preferred_element_type=jnp.float32) + vs[6:7, :]
        # TODO(synk): HF BERT uses exact erf GELU; tanh approx kept for kernel/ref parity.
        hmid = jax.nn.gelu(hmid, approximate=True)
        ffn = jnp.dot(hmid, w2_ref[0, l], preferred_element_type=jnp.float32) + vs[3:4, :H]
        x = _ln(x1 + ffn, vs[4:5, :H], vs[5:6, :H])

    # _pool_output(pooling='mean') + F.normalize(dim=1):
    # masked mean folded into a precomputed block-diagonal (mask/denom) matrix,
    # so pooling is one small matmul; then L2 normalize via rsqrt.
    pooled = jnp.dot(pool_ref[0], x, preferred_element_type=jnp.float32)     # (GB, H)
    sumsq = jnp.sum(pooled * pooled, axis=-1, keepdims=True)
    out_ref[0] = pooled * jax.lax.rsqrt(jnp.maximum(sumsq, 1e-24))


# --------------------------- weight packing (glue) --------------------------
def pack_encoder(p):
    """Pack one encoder's parameters into lane/sublane-friendly slabs.

    * SCALE = 1/sqrt(HD) is folded into wq / bq (constant weight transform).
    * Vector params are row-packed (one param per sublane row, lane offset 0),
      so in-kernel reads need no lane shifts.
    """
    wqkv = jnp.stack([jnp.concatenate([lp['wq'] * SCALE, lp['wk'], lp['wv']], axis=1)
                      for lp in p['layers']])                                  # (L, H, 3H)
    bqkv = jnp.stack([jnp.concatenate([lp['bq'] * SCALE, lp['bk'], lp['bv']], axis=1)
                      for lp in p['layers']])                                  # (L, 1, 3H)
    wo = jnp.stack([lp['wo'] for lp in p['layers']])                           # (L, H, H)
    w1 = jnp.stack([lp['w1'] for lp in p['layers']])                           # (L, H, FF)
    w2 = jnp.stack([lp['w2'] for lp in p['layers']])                           # (L, FF, H)

    def row(v):  # (1, W) -> (1, FF), zero-padded on the lane axis
        return jnp.pad(v, ((0, 0), (0, FF - v.shape[1])))

    # rows: 0 bo | 1 g1 | 2 be1 | 3 b2 | 4 g2 | 5 be2 | 6 b1 | 7 pad
    vslab = jnp.stack([jnp.concatenate(
        [row(lp['bo']), row(lp['g1']), row(lp['be1']),
         row(lp['b2']), row(lp['g2']), row(lp['be2']),
         row(lp['b1']), jnp.zeros((1, FF), jnp.float32)], axis=0)
        for lp in p['layers']])                                                # (L, 8, FF)
    gb = jnp.concatenate([p['emb_gamma'], p['emb_beta']], axis=0)              # (2, H)
    return dict(wqkv=wqkv, bqkv=bqkv, wo=wo, w1=w1, w2=w2, vslab=vslab, gb=gb)


# ------------------------------- forward ------------------------------------
@jax.jit
def simkgc_forward(params,
                   hr_token_ids, hr_mask, hr_token_type_ids,
                   tail_token_ids, tail_mask, tail_token_type_ids,
                   head_token_ids, head_mask, head_token_type_ids):
    hr_p, tl_p = params['hr_bert'], params['tail_bert']

    # Weights: 2-deep stacks (hr_bert, tail_bert). The tail weights are fetched
    # once for the combined tail+head step -- never duplicated.
    pk_hr, pk_tl = pack_encoder(hr_p), pack_encoder(tl_p)
    w = {k: jnp.stack([pk_hr[k], pk_tl[k]]) for k in pk_hr}

    pos = jnp.arange(S)

    def embed(p, ids, tt):   # embedding gathers stay in plain JAX (glue)
        e = p['word_emb'][ids] + p['pos_emb'][pos][None, :, :] + p['type_emb'][tt]
        return e.reshape(B * S, H)

    # step 0: hr branch (padded to GB sequences); step 1: tail + head row-stacked.
    emb = jnp.stack([
        jnp.concatenate([embed(hr_p, hr_token_ids, hr_token_type_ids),
                         jnp.zeros((B * S, H), jnp.float32)], axis=0),
        jnp.concatenate([embed(tl_p, tail_token_ids, tail_token_type_ids),
                         embed(tl_p, head_token_ids, head_token_type_ids)], axis=0),
    ])                                                                         # (2, ROWS, H)

    maskf = jnp.stack([
        jnp.concatenate([hr_mask.astype(jnp.float32),
                         jnp.zeros((B, S), jnp.float32)], axis=0),
        jnp.concatenate([tail_mask.astype(jnp.float32),
                         head_mask.astype(jnp.float32)], axis=0),
    ])                                                                         # (2, GB, S)

    bias = (1.0 - maskf) * -10000.0                      # hoisted attention bias (2, GB, S)

    # Mean-pool weights precomputed in the wrapper: block-diagonal matrix whose
    # row g holds mask[g, :] / clamp(sum(mask[g]), 1e-4) at columns g*S..g*S+S-1.
    denom = jnp.maximum(jnp.sum(maskf, axis=-1, keepdims=True), 1e-4)
    wmask = maskf / denom                                                      # (2, GB, S)
    eye = jnp.eye(GB, dtype=jnp.float32)
    pool = (wmask[:, :, None, :] * eye[None, :, :, None]).reshape(NSTEP, GB, ROWS)

    out = pl.pallas_call(
        _fused_encoder_kernel,
        out_shape=jax.ShapeDtypeStruct((NSTEP, GB, H), jnp.float32),
        grid=(NSTEP,),
        in_specs=[
            pl.BlockSpec((1, ROWS, H),     lambda g: (g, 0, 0)),
            pl.BlockSpec((1, GB, S),       lambda g: (g, 0, 0)),
            pl.BlockSpec((1, GB, ROWS),    lambda g: (g, 0, 0)),
            pl.BlockSpec((1, 2, H),        lambda g: (g, 0, 0)),
            pl.BlockSpec((1, L, H, 3 * H), lambda g: (g, 0, 0, 0)),
            pl.BlockSpec((1, L, 1, 3 * H), lambda g: (g, 0, 0, 0)),
            pl.BlockSpec((1, L, H, H),     lambda g: (g, 0, 0, 0)),
            pl.BlockSpec((1, L, H, FF),    lambda g: (g, 0, 0, 0)),
            pl.BlockSpec((1, L, FF, H),    lambda g: (g, 0, 0, 0)),
            pl.BlockSpec((1, L, 8, FF),    lambda g: (g, 0, 0, 0)),
        ],
        out_specs=pl.BlockSpec((1, GB, H), lambda g: (g, 0, 0)),
        compiler_params=pltpu.CompilerParams(dimension_semantics=("parallel",)),
    )(emb, bias, pool, w['gb'], w['wqkv'], w['bqkv'], w['wo'], w['w1'], w['w2'], w['vslab'])

    return {'hr_vector': out[0, :B],
            'tail_vector': out[1, :B],
            'head_vector': out[1, B:]}


# --------------------------- deterministic params ---------------------------
def init_bert_params(key):
    def nrm(k, shape):
        return 0.02 * jax.random.normal(k, shape, dtype=jnp.float32)

    keys = jax.random.split(key, 3 + L)
    params = {
        'word_emb': nrm(keys[0], (VOCAB, H)),
        'pos_emb': nrm(keys[1], (S, H)),
        'type_emb': nrm(keys[2], (TYPE_VOCAB, H)),
        'emb_gamma': jnp.ones((1, H), jnp.float32),
        'emb_beta': jnp.zeros((1, H), jnp.float32),
        'layers': [],
    }
    for l in range(L):
        lk = jax.random.split(keys[3 + l], 6)
        params['layers'].append({
            'wq': nrm(lk[0], (H, H)), 'bq': jnp.zeros((1, H), jnp.float32),
            'wk': nrm(lk[1], (H, H)), 'bk': jnp.zeros((1, H), jnp.float32),
            'wv': nrm(lk[2], (H, H)), 'bv': jnp.zeros((1, H), jnp.float32),
            'wo': nrm(lk[3], (H, H)), 'bo': jnp.zeros((1, H), jnp.float32),
            'g1': jnp.ones((1, H), jnp.float32), 'be1': jnp.zeros((1, H), jnp.float32),
            'w1': nrm(lk[4], (H, FF)), 'b1': jnp.zeros((1, FF), jnp.float32),
            'w2': nrm(lk[5], (FF, H)), 'b2': jnp.zeros((1, H), jnp.float32),
            'g2': jnp.ones((1, H), jnp.float32), 'be2': jnp.zeros((1, H), jnp.float32),
        })
    return params


# ----------------------------- pure-JAX reference ---------------------------
def _ref_encode(p, ids, mask, type_ids):
    hp = jax.lax.Precision.HIGHEST
    emb = (p['word_emb'][ids] + p['pos_emb'][jnp.arange(S)][None, :, :]
           + p['type_emb'][type_ids])
    x = _ln(emb, p['emb_gamma'], p['emb_beta'])
    bias = (1.0 - mask.astype(jnp.float32))[:, None, :] * -10000.0
    for lp in p['layers']:
        q = jnp.einsum('bsh,hk->bsk', x, lp['wq'], precision=hp) + lp['bq']
        k = jnp.einsum('bsh,hk->bsk', x, lp['wk'], precision=hp) + lp['bk']
        v = jnp.einsum('bsh,hk->bsk', x, lp['wv'], precision=hp) + lp['bv']
        ctxs = []
        for h in range(NH):
            sl = slice(h * HD, (h + 1) * HD)
            s = jnp.einsum('bqd,bkd->bqk', q[..., sl], k[..., sl], precision=hp) * SCALE + bias
            s = s - jnp.max(s, axis=-1, keepdims=True)
            pr = jnp.exp(s)
            pr = pr / jnp.sum(pr, axis=-1, keepdims=True)
            ctxs.append(jnp.einsum('bqk,bkd->bqd', pr, v[..., sl], precision=hp))
        ctx = jnp.concatenate(ctxs, axis=-1)
        ao = jnp.einsum('bsh,hk->bsk', ctx, lp['wo'], precision=hp) + lp['bo']
        x1 = _ln(x + ao, lp['g1'], lp['be1'])
        hm = jax.nn.gelu(jnp.einsum('bsh,hi->bsi', x1, lp['w1'], precision=hp) + lp['b1'],
                         approximate=True)
        ff = jnp.einsum('bsi,ih->bsh', hm, lp['w2'], precision=hp) + lp['b2']
        x = _ln(x1 + ff, lp['g2'], lp['be2'])
    m = mask.astype(jnp.float32)[:, :, None]
    vec = jnp.sum(x * m, axis=1) / jnp.maximum(jnp.sum(m, axis=1), 1e-4)
    norm = jnp.sqrt(jnp.sum(vec * vec, axis=1, keepdims=True))
    return vec / jnp.maximum(norm, 1e-12)


# ----------------------------------- main -----------------------------------
if __name__ == "__main__":
    root = jax.random.PRNGKey(0)
    kparam, kin = jax.random.split(root)

    hr_params = init_bert_params(kparam)
    # tail_bert = deepcopy(hr_bert) at init -> identical weights
    tail_params = jax.tree_util.tree_map(lambda a: a, hr_params)
    params = {'hr_bert': hr_params, 'tail_bert': tail_params}

    kids = jax.random.split(kin, 3)
    hr_token_ids = jax.random.randint(kids[0], (B, S), 0, VOCAB)
    tail_token_ids = jax.random.randint(kids[1], (B, S), 0, VOCAB)
    head_token_ids = jax.random.randint(kids[2], (B, S), 0, VOCAB)

    hr_mask = jnp.array([[1, 1, 1, 1, 1, 1, 1, 1],
                         [1, 1, 1, 1, 1, 1, 0, 0]], dtype=jnp.int32)
    tail_mask = jnp.array([[1, 1, 1, 1, 1, 0, 0, 0],
                           [1, 1, 1, 1, 1, 1, 1, 1]], dtype=jnp.int32)
    head_mask = jnp.array([[1, 1, 1, 1, 1, 1, 1, 0],
                           [1, 1, 1, 0, 0, 0, 0, 0]], dtype=jnp.int32)

    hr_token_type_ids = jnp.concatenate(
        [jnp.zeros((B, S // 2), jnp.int32), jnp.ones((B, S - S // 2), jnp.int32)], axis=1)
    tail_token_type_ids = jnp.zeros((B, S), jnp.int32)
    head_token_type_ids = jnp.zeros((B, S), jnp.int32)

    out = simkgc_forward(params,
                         hr_token_ids, hr_mask, hr_token_type_ids,
                         tail_token_ids, tail_mask, tail_token_type_ids,
                         head_token_ids, head_mask, head_token_type_ids)
    out = jax.block_until_ready(out)

    # sanity: pooled vectors are unit-norm and match a pure-JAX reference
    ref = {
        'hr_vector': _ref_encode(params['hr_bert'], hr_token_ids, hr_mask, hr_token_type_ids),
        'tail_vector': _ref_encode(params['tail_bert'], tail_token_ids, tail_mask, tail_token_type_ids),
        'head_vector': _ref_encode(params['tail_bert'], head_token_ids, head_mask, head_token_type_ids),
    }
    for name, v in out.items():
        assert v.shape == (B, H)
        assert bool(jnp.all(jnp.isfinite(v)))
        norms = jnp.sqrt(jnp.sum(v * v, axis=1))
        assert bool(jnp.allclose(norms, 1.0, atol=1e-3)), name
        assert bool(jnp.allclose(v, ref[name], atol=5e-3, rtol=5e-3)), name

    print("KERNEL_OK")
</pallas_src>

<mosaic_0001>
module attributes {stable_mosaic.version = 11 : i64} {
  func.func @_fused_encoder_kernel(%arg0: i32, %arg1: memref<1x32x32xf32, #tpu.memory_space<vmem>>, %arg2: memref<1x4x8xf32, #tpu.memory_space<vmem>>, %arg3: memref<1x4x32xf32, #tpu.memory_space<vmem>>, %arg4: memref<1x2x32xf32, #tpu.memory_space<vmem>>, %arg5: memref<1x2x32x96xf32, #tpu.memory_space<vmem>>, %arg6: memref<1x2x1x96xf32, #tpu.memory_space<vmem>>, %arg7: memref<1x2x32x32xf32, #tpu.memory_space<vmem>>, %arg8: memref<1x2x32x64xf32, #tpu.memory_space<vmem>>, %arg9: memref<1x2x64x32xf32, #tpu.memory_space<vmem>>, %arg10: memref<1x2x8x64xf32, #tpu.memory_space<vmem>>, %arg11: memref<1x4x32xf32, #tpu.memory_space<vmem>>) attributes {dimension_semantics = [#tpu.dimension_semantics<parallel>], iteration_bounds = array<i64: 2>, scalar_prefetch = 0 : i64, scratch_operands = 0 : i64, tpu.core_type = #tpu.core_type<tc>, window_params = [{transform_indices = @transform_0, window_bounds = array<i64: 1, 32, 32>}, {transform_indices = @transform_1, window_bounds = array<i64: 1, 4, 8>}, {transform_indices = @transform_2, window_bounds = array<i64: 1, 4, 32>}, {transform_indices = @transform_3, window_bounds = array<i64: 1, 2, 32>}, {transform_indices = @transform_4, window_bounds = array<i64: 1, 2, 32, 96>}, {transform_indices = @transform_5, window_bounds = array<i64: 1, 2, 1, 96>}, {transform_indices = @transform_6, window_bounds = array<i64: 1, 2, 32, 32>}, {transform_indices = @transform_7, window_bounds = array<i64: 1, 2, 32, 64>}, {transform_indices = @transform_8, window_bounds = array<i64: 1, 2, 64, 32>}, {transform_indices = @transform_9, window_bounds = array<i64: 1, 2, 8, 64>}, {transform_indices = @transform_10, window_bounds = array<i64: 1, 4, 32>}]} {
    %c0 = arith.constant 0 : index
    %c0_0 = arith.constant 0 : index
    %c0_1 = arith.constant 0 : index
    %0 = vector.load %arg4[%c0, %c0_0, %c0_1] : memref<1x2x32xf32, #tpu.memory_space<vmem>>, vector<1x2x32xf32>
    %1 = vector.shape_cast %0 : vector<1x2x32xf32> to vector<2x32xf32>
    %c0_2 = arith.constant 0 : index
    %c0_3 = arith.constant 0 : index
    %c0_4 = arith.constant 0 : index
    %2 = vector.load %arg1[%c0_2, %c0_3, %c0_4] : memref<1x32x32xf32, #tpu.memory_space<vmem>>, vector<1x32x32xf32>
    %3 = vector.shape_cast %2 : vector<1x32x32xf32> to vector<32x32xf32>
    %4 = vector.extract_strided_slice %1 {offsets = [0, 0], sizes = [1, 32], strides = [1, 1]} : vector<2x32xf32> to vector<1x32xf32>
    %5 = vector.extract_strided_slice %1 {offsets = [1, 0], sizes = [1, 32], strides = [1, 1]} : vector<2x32xf32> to vector<1x32xf32>
    %cst = arith.constant dense<0.000000e+00> : vector<32xf32>
    %6 = vector.multi_reduction <add>, %3, %cst [1] : vector<32x32xf32> to vector<32xf32>
    %7 = vector.shape_cast %6 : vector<32xf32> to vector<32x1xf32>
    %cst_5 = arith.constant 3.200000e+01 : f32
    %8 = vector.broadcast %cst_5 : f32 to vector<32x1xf32>
    %9 = arith.divf %7, %8 : vector<32x1xf32>
    %10 = vector.broadcast %9 : vector<32x1xf32> to vector<32x32xf32>
    %11 = arith.subf %3, %10 : vector<32x32xf32>
    %12 = arith.mulf %11, %11 : vector<32x32xf32>
    %cst_6 = arith.constant dense<0.000000e+00> : vector<32xf32>
    %13 = vector.multi_reduction <add>, %12, %cst_6 [1] : vector<32x32xf32> to vector<32xf32>
    %14 = vector.shape_cast %13 : vector<32xf32> to vector<32x1xf32>
    %cst_7 = arith.constant 3.200000e+01 : f32
    %15 = vector.broadcast %cst_7 : f32 to vector<32x1xf32>
    %16 = arith.divf %14, %15 : vector<32x1xf32>
    %17 = vector.broadcast %9 : vector<32x1xf32> to vector<32x32xf32>
    %18 = arith.subf %3, %17 : vector<32x32xf32>
    %cst_8 = arith.constant 9.99999996E-13 : f32
    %19 = vector.broadcast %cst_8 : f32 to vector<32x1xf32>
    %20 = arith.addf %16, %19 : vector<32x1xf32>
    %21 = math.rsqrt %20 : vector<32x1xf32>
    %22 = vector.broadcast %21 : vector<32x1xf32> to vector<32x32xf32>
    %23 = arith.mulf %18, %22 : vector<32x32xf32>
    %24 = vector.broadcast %4 : vector<1x32xf32> to vector<32x32xf32>
    %25 = arith.mulf %23, %24 : vector<32x32xf32>
    %26 = vector.broadcast %5 : vector<1x32xf32> to vector<32x32xf32>
    %27 = arith.addf %25, %26 : vector<32x32xf32>
    %c0_9 = arith.constant 0 : index
    %c0_10 = arith.constant 0 : index
    %c0_11 = arith.constant 0 : index
    %28 = vector.load %arg2[%c0_9, %c0_10, %c0_11] : memref<1x4x8xf32, #tpu.memory_space<vmem>>, vector<1x4x8xf32>
    %29 = vector.shape_cast %28 : vector<1x4x8xf32> to vector<4x8xf32>
    %30 = vector.shape_cast %29 : vector<4x8xf32> to vector<4x1x8xf32>
    %c0_12 = arith.constant 0 : index
    %c0_13 = arith.constant 0 : index
    %c0_14 = arith.constant 0 : index
    %c0_15 = arith.constant 0 : index
    %31 = vector.load %arg5[%c0_12, %c0_13, %c0_14, %c0_15] : memref<1x2x32x96xf32, #tpu.memory_space<vmem>>, vector<1x1x32x96xf32>
    %32 = vector.shape_cast %31 : vector<1x1x32x96xf32> to vector<32x96xf32>
    %c0_16 = arith.constant 0 : index
    %c0_17 = arith.constant 0 : index
    %c0_18 = arith.constant 0 : index
    %c0_19 = arith.constant 0 : index
    %33 = vector.load %arg6[%c0_16, %c0_17, %c0_18, %c0_19] : memref<1x2x1x96xf32, #tpu.memory_space<vmem>>, vector<1x1x1x96xf32>
    %34 = vector.shape_cast %33 : vector<1x1x1x96xf32> to vector<1x96xf32>
    %c0_20 = arith.constant 0 : index
    %c0_21 = arith.constant 0 : index
    %c0_22 = arith.constant 0 : index
    %c0_23 = arith.constant 0 : index
    %35 = vector.load %arg7[%c0_20, %c0_21, %c0_22, %c0_23] : memref<1x2x32x32xf32, #tpu.memory_space<vmem>>, vector<1x1x32x32xf32>
    %36 = vector.shape_cast %35 : vector<1x1x32x32xf32> to vector<32x32xf32>
    %c0_24 = arith.constant 0 : index
    %c0_25 = arith.constant 0 : index
    %c0_26 = arith.constant 0 : index
    %c0_27 = arith.constant 0 : index
    %37 = vector.load %arg10[%c0_24, %c0_25, %c0_26, %c0_27] : memref<1x2x8x64xf32, #tpu.memory_space<vmem>>, vector<1x1x8x64xf32>
    %38 = vector.shape_cast %37 : vector<1x1x8x64xf32> to vector<8x64xf32>
    %cst_28 = arith.constant dense<0.000000e+00> : vector<32x96xf32>
    %39 = tpu.matmul %27, %32, %cst_28 {dimension_numbers = #tpu.dot_dimension_numbers<[1], [0], [0], [1], [0, 0, 1, 1], [], []>} : vector<32x32xf32>, vector<32x96xf32>, vector<32x96xf32> -> vector<32x96xf32>
    %40 = vector.broadcast %34 : vector<1x96xf32> to vector<32x96xf32>
    %41 = arith.addf %39, %40 : vector<32x96xf32>
    %42 = vector.extract_strided_slice %38 {offsets = [0, 0], sizes = [1, 32], strides = [1, 1]} : vector<8x64xf32> to vector<1x32xf32>
    %43 = vector.extract_strided_slice %41 {offsets = [0, 0], sizes = [32, 16], strides = [1, 1]} : vector<32x96xf32> to vector<32x16xf32>
    %44 = vector.shape_cast %43 : vector<32x16xf32> to vector<4x8x16xf32>
    %45 = vector.extract_strided_slice %41 {offsets = [0, 32], sizes = [32, 16], strides = [1, 1]} : vector<32x96xf32> to vector<32x16xf32>
    %46 = vector.shape_cast %45 : vector<32x16xf32> to vector<4x8x16xf32>
    %47 = vector.extract_strided_slice %41 {offsets = [0, 64], sizes = [32, 16], strides = [1, 1]} : vector<32x96xf32> to vector<32x16xf32>
    %48 = vector.shape_cast %47 : vector<32x16xf32> to vector<4x8x16xf32>
    "tpu.trace_start"() <{level = 10 : i32, message = "bqd,bkd->bqk"}> : () -> ()
    %cst_29 = arith.constant dense<0.000000e+00> : vector<4x8x8xf32>
    %49 = tpu.matmul %44, %46, %cst_29 {dimension_numbers = #tpu.dot_dimension_numbers<[2], [2], [1], [1], [0, 0, 0, 1, 1, 1], [0], [0]>} : vector<4x8x16xf32>, vector<4x8x16xf32>, vector<4x8x8xf32> -> vector<4x8x8xf32>
    "tpu.trace_stop"() : () -> ()
    %50 = vector.broadcast %30 : vector<4x1x8xf32> to vector<4x8x8xf32>
    %51 = arith.addf %49, %50 : vector<4x8x8xf32>
    %cst_30 = arith.constant dense<0xFF800000> : vector<4x8xf32>
    %52 = vector.multi_reduction <maximumf>, %51, %cst_30 [2] : vector<4x8x8xf32> to vector<4x8xf32>
    %53 = vector.shape_cast %52 : vector<4x8xf32> to vector<4x8x1xf32>
    %54 = vector.broadcast %53 : vector<4x8x1xf32> to vector<4x8x8xf32>
    %55 = arith.subf %51, %54 : vector<4x8x8xf32>
    %56 = math.exp %55 : vector<4x8x8xf32>
    %cst_31 = arith.constant dense<0.000000e+00> : vector<4x8xf32>
    %57 = vector.multi_reduction <add>, %56, %cst_31 [2] : vector<4x8x8xf32> to vector<4x8xf32>
    %58 = vector.shape_cast %57 : vector<4x8xf32> to vector<4x8x1xf32>
    %59 = tpu.reciprocal %58 {approx = true} : vector<4x8x1xf32> -> vector<4x8x1xf32>
    %60 = vector.broadcast %59 : vector<4x8x1xf32> to vector<4x8x8xf32>
    %61 = arith.mulf %56, %60 : vector<4x8x8xf32>
    "tpu.trace_start"() <{level = 10 : i32, message = "bqk,bkd->bqd"}> : () -> ()
    %cst_32 = arith.constant dense<0.000000e+00> : vector<4x8x16xf32>
    %62 = tpu.matmul %61, %48, %cst_32 {dimension_numbers = #tpu.dot_dimension_numbers<[2], [1], [1], [2], [0, 0, 0, 1, 1, 2], [0], [0]>} : vector<4x8x8xf32>, vector<4x8x16xf32>, vector<4x8x16xf32> -> vector<4x8x16xf32>
    "tpu.trace_stop"() : () -> ()
    %63 = vector.shape_cast %62 : vector<4x8x16xf32> to vector<32x16xf32>
    %64 = vector.extract_strided_slice %36 {offsets = [0, 0], sizes = [16, 32], strides = [1, 1]} : vector<32x32xf32> to vector<16x32xf32>
    %cst_33 = arith.constant dense<0.000000e+00> : vector<32x32xf32>
    %65 = tpu.matmul %63, %64, %cst_33 {dimension_numbers = #tpu.dot_dimension_numbers<[1], [0], [0], [1], [0, 0, 1, 1], [], []>} : vector<32x16xf32>, vector<16x32xf32>, vector<32x32xf32> -> vector<32x32xf32>
    %66 = vector.broadcast %42 : vector<1x32xf32> to vector<32x32xf32>
    %67 = arith.addf %66, %65 : vector<32x32xf32>
    %68 = vector.extract_strided_slice %41 {offsets = [0, 16], sizes = [32, 16], strides = [1, 1]} : vector<32x96xf32> to vector<32x16xf32>
    %69 = vector.shape_cast %68 : vector<32x16xf32> to vector<4x8x16xf32>
    %70 = vector.extract_strided_slice %41 {offsets = [0, 48], sizes = [32, 16], strides = [1, 1]} : vector<32x96xf32> to vector<32x16xf32>
    %71 = vector.shape_cast %70 : vector<32x16xf32> to vector<4x8x16xf32>
    %72 = vector.extract_strided_slice %41 {offsets = [0, 80], sizes = [32, 16], strides = [1, 1]} : vector<32x96xf32> to vector<32x16xf32>
    %73 = vector.shape_cast %72 : vector<32x16xf32> to vector<4x8x16xf32>
    "tpu.trace_start"() <{level = 10 : i32, message = "bqd,bkd->bqk"}> : () -> ()
    %cst_34 = arith.constant dense<0.000000e+00> : vector<4x8x8xf32>
    %74 = tpu.matmul %69, %71, %cst_34 {dimension_numbers = #tpu.dot_dimension_numbers<[2], [2], [1], [1], [0, 0, 0, 1, 1, 1], [0], [0]>} : vector<4x8x16xf32>, vector<4x8x16xf32>, vector<4x8x8xf32> -> vector<4x8x8xf32>
    "tpu.trace_stop"() : () -> ()
    %75 = vector.broadcast %30 : vector<4x1x8xf32> to vector<4x8x8xf32>
    %76 = arith.addf %74, %75 : vector<4x8x8xf32>
    %cst_35 = arith.constant dense<0xFF800000> : vector<4x8xf32>
    %77 = vector.multi_reduction <maximumf>, %76, %cst_35 [2] : vector<4x8x8xf32> to vector<4x8xf32>
    %78 = vector.shape_cast %77 : vector<4x8xf32> to vector<4x8x1xf32>
    %79 = vector.broadcast %78 : vector<4x8x1xf32> to vector<4x8x8xf32>
    %80 = arith.subf %76, %79 : vector<4x8x8xf32>
    %81 = math.exp %80 : vector<4x8x8xf32>
    %cst_36 = arith.constant dense<0.000000e+00> : vector<4x8xf32>
    %82 = vector.multi_reduction <add>, %81, %cst_36 [2] : vector<4x8x8xf32> to vector<4x8xf32>
    %83 = vector.shape_cast %82 : vector<4x8xf32> to vector<4x8x1xf32>
    %84 = tpu.reciprocal %83 {approx = true} : vector<4x8x1xf32> -> vector<4x8x1xf32>
    %85 = vector.broadcast %84 : vector<4x8x1xf32> to vector<4x8x8xf32>
    %86 = arith.mulf %81, %85 : vector<4x8x8xf32>
    "tpu.trace_start"() <{level = 10 : i32, message = "bqk,bkd->bqd"}> : () -> ()
    %cst_37 = arith.constant dense<0.000000e+00> : vector<4x8x16xf32>
    %87 = tpu.matmul %86, %73, %cst_37 {dimension_numbers = #tpu.dot_dimension_numbers<[2], [1], [1], [2], [0, 0, 0, 1, 1, 2], [0], [0]>} : vector<4x8x8xf32>, vector<4x8x16xf32>, vector<4x8x16xf32> -> vector<4x8x16xf32>
    "tpu.trace_stop"() : () -> ()
    %88 = vector.shape_cast %87 : vector<4x8x16xf32> to vector<32x16xf32>
    %89 = vector.extract_strided_slice %36 {offsets = [16, 0], sizes = [16, 32], strides = [1, 1]} : vector<32x32xf32> to vector<16x32xf32>
    %cst_38 = arith.constant dense<0.000000e+00> : vector<32x32xf32>
    %90 = tpu.matmul %88, %89, %cst_38 {dimension_numbers = #tpu.dot_dimension_numbers<[1], [0], [0], [1], [0, 0, 1, 1], [], []>} : vector<32x16xf32>, vector<16x32xf32>, vector<32x32xf32> -> vector<32x32xf32>
    %91 = arith.addf %67, %90 : vector<32x32xf32>
    %92 = arith.addf %27, %91 : vector<32x32xf32>
    %93 = vector.extract_strided_slice %38 {offsets = [1, 0], sizes = [1, 32], strides = [1, 1]} : vector<8x64xf32> to vector<1x32xf32>
    %94 = vector.extract_strided_slice %38 {offsets = [2, 0], sizes = [1, 32], strides = [1, 1]} : vector<8x64xf32> to vector<1x32xf32>
    %cst_39 = arith.constant dense<0.000000e+00> : vector<32xf32>
    %95 = vector.multi_reduction <add>, %92, %cst_39 [1] : vector<32x32xf32> to vector<32xf32>
    %96 = vector.shape_cast %95 : vector<32xf32> to vector<32x1xf32>
    %cst_40 = arith.constant 3.200000e+01 : f32
    %97 = vector.broadcast %cst_40 : f32 to vector<32x1xf32>
    %98 = arith.divf %96, %97 : vector<32x1xf32>
    %99 = vector.broadcast %98 : vector<32x1xf32> to vector<32x32xf32>
    %100 = arith.subf %92, %99 : vector<32x32xf32>
    %101 = arith.mulf %100, %100 : vector<32x32xf32>
    %cst_41 = arith.constant dense<0.000000e+00> : vector<32xf32>
    %102 = vector.multi_reduction <add>, %101, %cst_41 [1] : vector<32x32xf32> to vector<32xf32>
    %103 = vector.shape_cast %102 : vector<32xf32> to vector<32x1xf32>
    %cst_42 = arith.constant 3.200000e+01 : f32
    %104 = vector.broadcast %cst_42 : f32 to vector<32x1xf32>
    %105 = arith.divf %103, %104 : vector<32x1xf32>
    %106 = vector.broadcast %98 : vector<32x1xf32> to vector<32x32xf32>
    %107 = arith.subf %92, %106 : vector<32x32xf32>
    %cst_43 = arith.constant 9.99999996E-13 : f32
    %108 = vector.broadcast %cst_43 : f32 to vector<32x1xf32>
    %109 = arith.addf %105, %108 : vector<32x1xf32>
    %110 = math.rsqrt %109 : vector<32x1xf32>
    %111 = vector.broadcast %110 : vector<32x1xf32> to vector<32x32xf32>
    %112 = arith.mulf %107, %111 : vector<32x32xf32>
    %113 = vector.broadcast %93 : vector<1x32xf32> to vector<32x32xf32>
    %114 = arith.mulf %112, %113 : vector<32x32xf32>
    %115 = vector.broadcast %94 : vector<1x32xf32> to vector<32x32xf32>
    %116 = arith.addf %114, %115 : vector<32x32xf32>
    %c0_44 = arith.constant 0 : index
    %c0_45 = arith.constant 0 : index
    %c0_46 = arith.constant 0 : index
    %c0_47 = arith.constant 0 : index
    %117 = vector.load %arg8[%c0_44, %c0_45, %c0_46, %c0_47] : memref<1x2x32x64xf32, #tpu.memory_space<vmem>>, vector<1x1x32x64xf32>
    %118 = vector.shape_cast %117 : vector<1x1x32x64xf32> to vector<32x64xf32>
    %cst_48 = arith.constant dense<0.000000e+00> : vector<32x64xf32>
    %119 = tpu.matmul %116, %118, %cst_48 {dimension_numbers = #tpu.dot_dimension_numbers<[1], [0], [0], [1], [0, 0, 1, 1], [], []>} : vector<32x32xf32>, vector<32x64xf32>, vector<32x64xf32> -> vector<32x64xf32>
    %120 = vector.extract_strided_slice %38 {offsets = [6, 0], sizes = [1, 64], strides = [1, 1]} : vector<8x64xf32> to vector<1x64xf32>
    %121 = vector.broadcast %120 : vector<1x64xf32> to vector<32x64xf32>
    %122 = arith.addf %119, %121 : vector<32x64xf32>
    %123 = arith.mulf %122, %122 : vector<32x64xf32>
    %124 = arith.mulf %122, %123 : vector<32x64xf32>
    %cst_49 = arith.constant 4.471500e-02 : f32
    %125 = vector.broadcast %cst_49 : f32 to vector<32x64xf32>
    %126 = arith.mulf %125, %124 : vector<32x64xf32>
    %127 = arith.addf %122, %126 : vector<32x64xf32>
    %cst_50 = arith.constant 0.797884583 : f32
    %128 = vector.broadcast %cst_50 : f32 to vector<32x64xf32>
    %129 = arith.mulf %128, %127 : vector<32x64xf32>
    %130 = math.tanh %129 : vector<32x64xf32>
    %cst_51 = arith.constant 1.000000e+00 : f32
    %131 = vector.broadcast %cst_51 : f32 to vector<32x64xf32>
    %132 = arith.addf %131, %130 : vector<32x64xf32>
    %cst_52 = arith.constant 5.000000e-01 : f32
    %133 = vector.broadcast %cst_52 : f32 to vector<32x64xf32>
    %134 = arith.mulf %133, %132 : vector<32x64xf32>
    %135 = arith.mulf %122, %134 : vector<32x64xf32>
    %c0_53 = arith.constant 0 : index
    %c0_54 = arith.constant 0 : index
    %c0_55 = arith.constant 0 : index
    %c0_56 = arith.constant 0 : index
    %136 = vector.load %arg9[%c0_53, %c0_54, %c0_55, %c0_56] : memref<1x2x64x32xf32, #tpu.memory_space<vmem>>, vector<1x1x64x32xf32>
    %137 = vector.shape_cast %136 : vector<1x1x64x32xf32> to vector<64x32xf32>
    %cst_57 = arith.constant dense<0.000000e+00> : vector<32x32xf32>
    %138 = tpu.matmul %135, %137, %cst_57 {dimension_numbers = #tpu.dot_dimension_numbers<[1], [0], [0], [1], [0, 0, 1, 1], [], []>} : vector<32x64xf32>, vector<64x32xf32>, vector<32x32xf32> -> vector<32x32xf32>
    %139 = vector.extract_strided_slice %38 {offsets = [3, 0], sizes = [1, 32], strides = [1, 1]} : vector<8x64xf32> to vector<1x32xf32>
    %140 = vector.broadcast %139 : vector<1x32xf32> to vector<32x32xf32>
    %141 = arith.addf %138, %140 : vector<32x32xf32>
    %142 = arith.addf %116, %141 : vector<32x32xf32>
    %143 = vector.extract_strided_slice %38 {offsets = [4, 0], sizes = [1, 32], strides = [1, 1]} : vector<8x64xf32> to vector<1x32xf32>
    %144 = vector.extract_strided_slice %38 {offsets = [5, 0], sizes = [1, 32], strides = [1, 1]} : vector<8x64xf32> to vector<1x32xf32>
    %cst_58 = arith.constant dense<0.000000e+00> : vector<32xf32>
    %145 = vector.multi_reduction <add>, %142, %cst_58 [1] : vector<32x32xf32> to vector<32xf32>
    %146 = vector.shape_cast %145 : vector<32xf32> to vector<32x1xf32>
    %cst_59 = arith.constant 3.200000e+01 : f32
    %147 = vector.broadcast %cst_59 : f32 to vector<32x1xf32>
    %148 = arith.divf %146, %147 : vector<32x1xf32>
    %149 = vector.broadcast %148 : vector<32x1xf32> to vector<32x32xf32>
    %150 = arith.subf %142, %149 : vector<32x32xf32>
    %151 = arith.mulf %150, %150 : vector<32x32xf32>
    %cst_60 = arith.constant dense<0.000000e+00> : vector<32xf32>
    %152 = vector.multi_reduction <add>, %151, %cst_60 [1] : vector<32x32xf32> to vector<32xf32>
    %153 = vector.shape_cast %152 : vector<32xf32> to vector<32x1xf32>
    %cst_61 = arith.constant 3.200000e+01 : f32
    %154 = vector.broadcast %cst_61 : f32 to vector<32x1xf32>
    %155 = arith.divf %153, %154 : vector<32x1xf32>
    %156 = vector.broadcast %148 : vector<32x1xf32> to vector<32x32xf32>
    %157 = arith.subf %142, %156 : vector<32x32xf32>
    %cst_62 = arith.constant 9.99999996E-13 : f32
    %158 = vector.broadcast %cst_62 : f32 to vector<32x1xf32>
    %159 = arith.addf %155, %158 : vector<32x1xf32>
    %160 = math.rsqrt %159 : vector<32x1xf32>
    %161 = vector.broadcast %160 : vector<32x1xf32> to vector<32x32xf32>
    %162 = arith.mulf %157, %161 : vector<32x32xf32>
    %163 = vector.broadcast %143 : vector<1x32xf32> to vector<32x32xf32>
    %164 = arith.mulf %162, %163 : vector<32x32xf32>
    %165 = vector.broadcast %144 : vector<1x32xf32> to vector<32x32xf32>
    %166 = arith.addf %164, %165 : vector<32x32xf32>
    %c0_63 = arith.constant 0 : index
    %c1 = arith.constant 1 : index
    %c0_64 = arith.constant 0 : index
    %c0_65 = arith.constant 0 : index
    %167 = vector.load %arg5[%c0_63, %c1, %c0_64, %c0_65] : memref<1x2x32x96xf32, #tpu.memory_space<vmem>>, vector<1x1x32x96xf32>
    %168 = vector.shape_cast %167 : vector<1x1x32x96xf32> to vector<32x96xf32>
    %c0_66 = arith.constant 0 : index
    %c1_67 = arith.constant 1 : index
    %c0_68 = arith.constant 0 : index
    %c0_69 = arith.constant 0 : index
    %169 = vector.load %arg6[%c0_66, %c1_67, %c0_68, %c0_69] : memref<1x2x1x96xf32, #tpu.memory_space<vmem>>, vector<1x1x1x96xf32>
    %170 = vector.shape_cast %169 : vector<1x1x1x96xf32> to vector<1x96xf32>
    %c0_70 = arith.constant 0 : index
    %c1_71 = arith.constant 1 : index
    %c0_72 = arith.constant 0 : index
    %c0_73 = arith.constant 0 : index
    %171 = vector.load %arg7[%c0_70, %c1_71, %c0_72, %c0_73] : memref<1x2x32x32xf32, #tpu.memory_space<vmem>>, vector<1x1x32x32xf32>
    %172 = vector.shape_cast %171 : vector<1x1x32x32xf32> to vector<32x32xf32>
    %c0_74 = arith.constant 0 : index
    %c1_75 = arith.constant 1 : index
    %c0_76 = arith.constant 0 : index
    %c0_77 = arith.constant 0 : index
    %173 = vector.load %arg10[%c0_74, %c1_75, %c0_76, %c0_77] : memref<1x2x8x64xf32, #tpu.memory_space<vmem>>, vector<1x1x8x64xf32>
    %174 = vector.shape_cast %173 : vector<1x1x8x64xf32> to vector<8x64xf32>
    %cst_78 = arith.constant dense<0.000000e+00> : vector<32x96xf32>
    %175 = tpu.matmul %166, %168, %cst_78 {dimension_numbers = #tpu.dot_dimension_numbers<[1], [0], [0], [1], [0, 0, 1, 1], [], []>} : vector<32x32xf32>, vector<32x96xf32>, vector<32x96xf32> -> vector<32x96xf32>
    %176 = vector.broadcast %170 : vector<1x96xf32> to vector<32x96xf32>
    %177 = arith.addf %175, %176 : vector<32x96xf32>
    %178 = vector.extract_strided_slice %174 {offsets = [0, 0], sizes = [1, 32], strides = [1, 1]} : vector<8x64xf32> to vector<1x32xf32>
    %179 = vector.extract_strided_slice %177 {offsets = [0, 0], sizes = [32, 16], strides = [1, 1]} : vector<32x96xf32> to vector<32x16xf32>
    %180 = vector.shape_cast %179 : vector<32x16xf32> to vector<4x8x16xf32>
    %181 = vector.extract_strided_slice %177 {offsets = [0, 32], sizes = [32, 16], strides = [1, 1]} : vector<32x96xf32> to vector<32x16xf32>
    %182 = vector.shape_cast %181 : vector<32x16xf32> to vector<4x8x16xf32>
    %183 = vector.extract_strided_slice %177 {offsets = [0, 64], sizes = [32, 16], strides = [1, 1]} : vector<32x96xf32> to vector<32x16xf32>
    %184 = vector.shape_cast %183 : vector<32x16xf32> to vector<4x8x16xf32>
    "tpu.trace_start"() <{level = 10 : i32, message = "bqd,bkd->bqk"}> : () -> ()
    %cst_79 = arith.constant dense<0.000000e+00> : vector<4x8x8xf32>
    %185 = tpu.matmul %180, %182, %cst_79 {dimension_numbers = #tpu.dot_dimension_numbers<[2], [2], [1], [1], [0, 0, 0, 1, 1, 1], [0], [0]>} : vector<4x8x16xf32>, vector<4x8x16xf32>, vector<4x8x8xf32> -> vector<4x8x8xf32>
    "tpu.trace_stop"() : () -> ()
    %186 = vector.broadcast %30 : vector<4x1x8xf32> to vector<4x8x8xf32>
    %187 = arith.addf %185, %186 : vector<4x8x8xf32>
    %cst_80 = arith.constant dense<0xFF800000> : vector<4x8xf32>
    %188 = vector.multi_reduction <maximumf>, %187, %cst_80 [2] : vector<4x8x8xf32> to vector<4x8xf32>
    %189 = vector.shape_cast %188 : vector<4x8xf32> to vector<4x8x1xf32>
    %190 = vector.broadcast %189 : vector<4x8x1xf32> to vector<4x8x8xf32>
    %191 = arith.subf %187, %190 : vector<4x8x8xf32>
    %192 = math.exp %191 : vector<4x8x8xf32>
    %cst_81 = arith.constant dense<0.000000e+00> : vector<4x8xf32>
    %193 = vector.multi_reduction <add>, %192, %cst_81 [2] : vector<4x8x8xf32> to vector<4x8xf32>
    %194 = vector.shape_cast %193 : vector<4x8xf32> to vector<4x8x1xf32>
    %195 = tpu.reciprocal %194 {approx = true} : vector<4x8x1xf32> -> vector<4x8x1xf32>
    %196 = vector.broadcast %195 : vector<4x8x1xf32> to vector<4x8x8xf32>
    %197 = arith.mulf %192, %196 : vector<4x8x8xf32>
    "tpu.trace_start"() <{level = 10 : i32, message = "bqk,bkd->bqd"}> : () -> ()
    %cst_82 = arith.constant dense<0.000000e+00> : vector<4x8x16xf32>
    %198 = tpu.matmul %197, %184, %cst_82 {dimension_numbers = #tpu.dot_dimension_numbers<[2], [1], [1], [2], [0, 0, 0, 1, 1, 2], [0], [0]>} : vector<4x8x8xf32>, vector<4x8x16xf32>, vector<4x8x16xf32> -> vector<4x8x16xf32>
    "tpu.trace_stop"() : () -> ()
    %199 = vector.shape_cast %198 : vector<4x8x16xf32> to vector<32x16xf32>
    %200 = vector.extract_strided_slice %172 {offsets = [0, 0], sizes = [16, 32], strides = [1, 1]} : vector<32x32xf32> to vector<16x32xf32>
    %cst_83 = arith.constant dense<0.000000e+00> : vector<32x32xf32>
    %201 = tpu.matmul %199, %200, %cst_83 {dimension_numbers = #tpu.dot_dimension_numbers<[1], [0], [0], [1], [0, 0, 1, 1], [], []>} : vector<32x16xf32>, vector<16x32xf32>, vector<32x32xf32> -> vector<32x32xf32>
    %202 = vector.broadcast %178 : vector<1x32xf32> to vector<32x32xf32>
    %203 = arith.addf %202, %201 : vector<32x32xf32>
    %204 = vector.extract_strided_slice %177 {offsets = [0, 16], sizes = [32, 16], strides = [1, 1]} : vector<32x96xf32> to vector<32x16xf32>
    %205 = vector.shape_cast %204 : vector<32x16xf32> to vector<4x8x16xf32>
    %206 = vector.extract_strided_slice %177 {offsets = [0, 48], sizes = [32, 16], strides = [1, 1]} : vector<32x96xf32> to vector<32x16xf32>
    %207 = vector.shape_cast %206 : vector<32x16xf32> to vector<4x8x16xf32>
    %208 = vector.extract_strided_slice %177 {offsets = [0, 80], sizes = [32, 16], strides = [1, 1]} : vector<32x96xf32> to vector<32x16xf32>
    %209 = vector.shape_cast %208 : vector<32x16xf32> to vector<4x8x16xf32>
    "tpu.trace_start"() <{level = 10 : i32, message = "bqd,bkd->bqk"}> : () -> ()
    %cst_84 = arith.constant dense<0.000000e+00> : vector<4x8x8xf32>
    %210 = tpu.matmul %205, %207, %cst_84 {dimension_numbers = #tpu.dot_dimension_numbers<[2], [2], [1], [1], [0, 0, 0, 1, 1, 1], [0], [0]>} : vector<4x8x16xf32>, vector<4x8x16xf32>, vector<4x8x8xf32> -> vector<4x8x8xf32>
    "tpu.trace_stop"() : () -> ()
    %211 = vector.broadcast %30 : vector<4x1x8xf32> to vector<4x8x8xf32>
    %212 = arith.addf %210, %211 : vector<4x8x8xf32>
    %cst_85 = arith.constant dense<0xFF800000> : vector<4x8xf32>
    %213 = vector.multi_reduction <maximumf>, %212, %cst_85 [2] : vector<4x8x8xf32> to vector<4x8xf32>
    %214 = vector.shape_cast %213 : vector<4x8xf32> to vector<4x8x1xf32>
    %215 = vector.broadcast %214 : vector<4x8x1xf32> to vector<4x8x8xf32>
    %216 = arith.subf %212, %215 : vector<4x8x8xf32>
    %217 = math.exp %216 : vector<4x8x8xf32>
    %cst_86 = arith.constant dense<0.000000e+00> : vector<4x8xf32>
    %218 = vector.multi_reduction <add>, %217, %cst_86 [2] : vector<4x8x8xf32> to vector<4x8xf32>
    %219 = vector.shape_cast %218 : vector<4x8xf32> to vector<4x8x1xf32>
    %220 = tpu.reciprocal %219 {approx = true} : vector<4x8x1xf32> -> vector<4x8x1xf32>
    %221 = vector.broadcast %220 : vector<4x8x1xf32> to vector<4x8x8xf32>
    %222 = arith.mulf %217, %221 : vector<4x8x8xf32>
    "tpu.trace_start"() <{level = 10 : i32, message = "bqk,bkd->bqd"}> : () -> ()
    %cst_87 = arith.constant dense<0.000000e+00> : vector<4x8x16xf32>
    %223 = tpu.matmul %222, %209, %cst_87 {dimension_numbers = #tpu.dot_dimension_numbers<[2], [1], [1], [2], [0, 0, 0, 1, 1, 2], [0], [0]>} : vector<4x8x8xf32>, vector<4x8x16xf32>, vector<4x8x16xf32> -> vector<4x8x16xf32>
    "tpu.trace_stop"() : () -> ()
    %224 = vector.shape_cast %223 : vector<4x8x16xf32> to vector<32x16xf32>
    %225 = vector.extract_strided_slice %172 {offsets = [16, 0], sizes = [16, 32], strides = [1, 1]} : vector<32x32xf32> to vector<16x32xf32>
    %cst_88 = arith.constant dense<0.000000e+00> : vector<32x32xf32>
    %226 = tpu.matmul %224, %225, %cst_88 {dimension_numbers = #tpu.dot_dimension_numbers<[1], [0], [0], [1], [0, 0, 1, 1], [], []>} : vector<32x16xf32>, vector<16x32xf32>, vector<32x32xf32> -> vector<32x32xf32>
    %227 = arith.addf %203, %226 : vector<32x32xf32>
    %228 = arith.addf %166, %227 : vector<32x32xf32>
    %229 = vector.extract_strided_slice %174 {offsets = [1, 0], sizes = [1, 32], strides = [1, 1]} : vector<8x64xf32> to vector<1x32xf32>
    %230 = vector.extract_strided_slice %174 {offsets = [2, 0], sizes = [1, 32], strides = [1, 1]} : vector<8x64xf32> to vector<1x32xf32>
    %cst_89 = arith.constant dense<0.000000e+00> : vector<32xf32>
    %231 = vector.multi_reduction <add>, %228, %cst_89 [1] : vector<32x32xf32> to vector<32xf32>
    %232 = vector.shape_cast %231 : vector<32xf32> to vector<32x1xf32>
    %cst_90 = arith.constant 3.200000e+01 : f32
    %233 = vector.broadcast %cst_90 : f32 to vector<32x1xf32>
    %234 = arith.divf %232, %233 : vector<32x1xf32>
    %235 = vector.broadcast %234 : vector<32x1xf32> to vector<32x32xf32>
    %236 = arith.subf %228, %235 : vector<32x32xf32>
    %237 = arith.mulf %236, %236 : vector<32x32xf32>
    %cst_91 = arith.constant dense<0.000000e+00> : vector<32xf32>
    %238 = vector.multi_reduction <add>, %237, %cst_91 [1] : vector<32x32xf32> to vector<32xf32>
    %239 = vector.shape_cast %238 : vector<32xf32> to vector<32x1xf32>
    %cst_92 = arith.constant 3.200000e+01 : f32
    %240 = vector.broadcast %cst_92 : f32 to vector<32x1xf32>
    %241 = arith.divf %239, %240 : vector<32x1xf32>
    %242 = vector.broadcast %234 : vector<32x1xf32> to vector<32x32xf32>
    %243 = arith.subf %228, %242 : vector<32x32xf32>
    %cst_93 = arith.constant 9.99999996E-13 : f32
    %244 = vector.broadcast %cst_93 : f32 to vector<32x1xf32>
    %245 = arith.addf %241, %244 : vector<32x1xf32>
    %246 = math.rsqrt %245 : vector<32x1xf32>
    %247 = vector.broadcast %246 : vector<32x1xf32> to vector<32x32xf32>
    %248 = arith.mulf %243, %247 : vector<32x32xf32>
    %249 = vector.broadcast %229 : vector<1x32xf32> to vector<32x32xf32>
    %250 = arith.mulf %248, %249 : vector<32x32xf32>
    %251 = vector.broadcast %230 : vector<1x32xf32> to vector<32x32xf32>
    %252 = arith.addf %250, %251 : vector<32x32xf32>
    %c0_94 = arith.constant 0 : index
    %c1_95 = arith.constant 1 : index
    %c0_96 = arith.constant 0 : index
    %c0_97 = arith.constant 0 : index
    %253 = vector.load %arg8[%c0_94, %c1_95, %c0_96, %c0_97] : memref<1x2x32x64xf32, #tpu.memory_space<vmem>>, vector<1x1x32x64xf32>
    %254 = vector.shape_cast %253 : vector<1x1x32x64xf32> to vector<32x64xf32>
    %cst_98 = arith.constant dense<0.000000e+00> : vector<32x64xf32>
    %255 = tpu.matmul %252, %254, %cst_98 {dimension_numbers = #tpu.dot_dimension_numbers<[1], [0], [0], [1], [0, 0, 1, 1], [], []>} : vector<32x32xf32>, vector<32x64xf32>, vector<32x64xf32> -> vector<32x64xf32>
    %256 = vector.extract_strided_slice %174 {offsets = [6, 0], sizes = [1, 64], strides = [1, 1]} : vector<8x64xf32> to vector<1x64xf32>
    %257 = vector.broadcast %256 : vector<1x64xf32> to vector<32x64xf32>
    %258 = arith.addf %255, %257 : vector<32x64xf32>
    %259 = arith.mulf %258, %258 : vector<32x64xf32>
    %260 = arith.mulf %258, %259 : vector<32x64xf32>
    %cst_99 = arith.constant 4.471500e-02 : f32
    %261 = vector.broadcast %cst_99 : f32 to vector<32x64xf32>
    %262 = arith.mulf %261, %260 : vector<32x64xf32>
    %263 = arith.addf %258, %262 : vector<32x64xf32>
    %cst_100 = arith.constant 0.797884583 : f32
    %264 = vector.broadcast %cst_100 : f32 to vector<32x64xf32>
    %265 = arith.mulf %264, %263 : vector<32x64xf32>
    %266 = math.tanh %265 : vector<32x64xf32>
    %cst_101 = arith.constant 1.000000e+00 : f32
    %267 = vector.broadcast %cst_101 : f32 to vector<32x64xf32>
    %268 = arith.addf %267, %266 : vector<32x64xf32>
    %cst_102 = arith.constant 5.000000e-01 : f32
    %269 = vector.broadcast %cst_102 : f32 to vector<32x64xf32>
    %270 = arith.mulf %269, %268 : vector<32x64xf32>
    %271 = arith.mulf %258, %270 : vector<32x64xf32>
    %c0_103 = arith.constant 0 : index
    %c1_104 = arith.constant 1 : index
    %c0_105 = arith.constant 0 : index
    %c0_106 = arith.constant 0 : index
    %272 = vector.load %arg9[%c0_103, %c1_104, %c0_105, %c0_106] : memref<1x2x64x32xf32, #tpu.memory_space<vmem>>, vector<1x1x64x32xf32>
    %273 = vector.shape_cast %272 : vector<1x1x64x32xf32> to vector<64x32xf32>
    %cst_107 = arith.constant dense<0.000000e+00> : vector<32x32xf32>
    %274 = tpu.matmul %271, %273, %cst_107 {dimension_numbers = #tpu.dot_dimension_numbers<[1], [0], [0], [1], [0, 0, 1, 1], [], []>} : vector<32x64xf32>, vector<64x32xf32>, vector<32x32xf32> -> vector<32x32xf32>
    %275 = vector.extract_strided_slice %174 {offsets = [3, 0], sizes = [1, 32], strides = [1, 1]} : vector<8x64xf32> to vector<1x32xf32>
    %276 = vector.broadcast %275 : vector<1x32xf32> to vector<32x32xf32>
    %277 = arith.addf %274, %276 : vector<32x32xf32>
    %278 = arith.addf %252, %277 : vector<32x32xf32>
    %279 = vector.extract_strided_slice %174 {offsets = [4, 0], sizes = [1, 32], strides = [1, 1]} : vector<8x64xf32> to vector<1x32xf32>
    %280 = vector.extract_strided_slice %174 {offsets = [5, 0], sizes = [1, 32], strides = [1, 1]} : vector<8x64xf32> to vector<1x32xf32>
    %cst_108 = arith.constant dense<0.000000e+00> : vector<32xf32>
    %281 = vector.multi_reduction <add>, %278, %cst_108 [1] : vector<32x32xf32> to vector<32xf32>
    %282 = vector.shape_cast %281 : vector<32xf32> to vector<32x1xf32>
    %cst_109 = arith.constant 3.200000e+01 : f32
    %283 = vector.broadcast %cst_109 : f32 to vector<32x1xf32>
    %284 = arith.divf %282, %283 : vector<32x1xf32>
    %285 = vector.broadcast %284 : vector<32x1xf32> to vector<32x32xf32>
    %286 = arith.subf %278, %285 : vector<32x32xf32>
    %287 = arith.mulf %286, %286 : vector<32x32xf32>
    %cst_110 = arith.constant dense<0.000000e+00> : vector<32xf32>
    %288 = vector.multi_reduction <add>, %287, %cst_110 [1] : vector<32x32xf32> to vector<32xf32>
    %289 = vector.shape_cast %288 : vector<32xf32> to vector<32x1xf32>
    %cst_111 = arith.constant 3.200000e+01 : f32
    %290 = vector.broadcast %cst_111 : f32 to vector<32x1xf32>
    %291 = arith.divf %289, %290 : vector<32x1xf32>
    %292 = vector.broadcast %284 : vector<32x1xf32> to vector<32x32xf32>
    %293 = arith.subf %278, %292 : vector<32x32xf32>
    %cst_112 = arith.constant 9.99999996E-13 : f32
    %294 = vector.broadcast %cst_112 : f32 to vector<32x1xf32>
    %295 = arith.addf %291, %294 : vector<32x1xf32>
    %296 = math.rsqrt %295 : vector<32x1xf32>
    %297 = vector.broadcast %296 : vector<32x1xf32> to vector<32x32xf32>
    %298 = arith.mulf %293, %297 : vector<32x32xf32>
    %299 = vector.broadcast %279 : vector<1x32xf32> to vector<32x32xf32>
    %300 = arith.mulf %298, %299 : vector<32x32xf32>
    %301 = vector.broadcast %280 : vector<1x32xf32> to vector<32x32xf32>
    %302 = arith.addf %300, %301 : vector<32x32xf32>
    %c0_113 = arith.constant 0 : index
    %c0_114 = arith.constant 0 : index
    %c0_115 = arith.constant 0 : index
    %303 = vector.load %arg3[%c0_113, %c0_114, %c0_115] : memref<1x4x32xf32, #tpu.memory_space<vmem>>, vector<1x4x32xf32>
    %304 = vector.shape_cast %303 : vector<1x4x32xf32> to vector<4x32xf32>
    %cst_116 = arith.constant dense<0.000000e+00> : vector<4x32xf32>
    %305 = tpu.matmul %304, %302, %cst_116 {dimension_numbers = #tpu.dot_dimension_numbers<[1], [0], [0], [1], [0, 0, 1, 1], [], []>} : vector<4x32xf32>, vector<32x32xf32>, vector<4x32xf32> -> vector<4x32xf32>
    %306 = arith.mulf %305, %305 : vector<4x32xf32>
    %cst_117 = arith.constant dense<0.000000e+00> : vector<4xf32>
    %307 = vector.multi_reduction <add>, %306, %cst_117 [1] : vector<4x32xf32> to vector<4xf32>
    %308 = vector.shape_cast %307 : vector<4xf32> to vector<4x1xf32>
    %cst_118 = arith.constant 1.000000e-24 : f32
    %309 = vector.broadcast %cst_118 : f32 to vector<4x1xf32>
    %310 = arith.maximumf %308, %309 : vector<4x1xf32>
    %311 = math.rsqrt %310 : vector<4x1xf32>
    %312 = vector.broadcast %311 : vector<4x1xf32> to vector<4x32xf32>
    %313 = arith.mulf %305, %312 : vector<4x32xf32>
    %c0_119 = arith.constant 0 : index
    %c0_120 = arith.constant 0 : index
    %c0_121 = arith.constant 0 : index
    %314 = vector.load %arg11[%c0_119, %c0_120, %c0_121] : memref<1x4x32xf32, #tpu.memory_space<vmem>>, vector<1x4x32xf32>
    %315 = vector.shape_cast %314 : vector<1x4x32xf32> to vector<4x32xf32>
    %316 = vector.shape_cast %313 : vector<4x32xf32> to vector<1x4x32xf32>
    tpu.vector_store %arg11[%c0_119, %c0_120, %c0_121], %316 {strides = array<i32>} : memref<1x4x32xf32, #tpu.memory_space<vmem>>, vector<1x4x32xf32>,
    return
  }
  func.func @transform_0(%arg0: i32) -> (i32, i32, i32) {
    %c0_i32 = arith.constant 0 : i32
    %c0_i32_0 = arith.constant 0 : i32
    %c0_i32_1 = arith.constant 0 : i32
    return %arg0, %c0_i32, %c0_i32_0 : i32, i32, i32
  }
  func.func @transform_1(%arg0: i32) -> (i32, i32, i32) {
    %c0_i32 = arith.constant 0 : i32
    %c0_i32_0 = arith.constant 0 : i32
    %c0_i32_1 = arith.constant 0 : i32
    return %arg0, %c0_i32, %c0_i32_0 : i32, i32, i32
  }
  func.func @transform_2(%arg0: i32) -> (i32, i32, i32) {
    %c0_i32 = arith.constant 0 : i32
    %c0_i32_0 = arith.constant 0 : i32
    %c0_i32_1 = arith.constant 0 : i32
    return %arg0, %c0_i32, %c0_i32_0 : i32, i32, i32
  }
  func.func @transform_3(%arg0: i32) -> (i32, i32, i32) {
    %c0_i32 = arith.constant 0 : i32
    %c0_i32_0 = arith.constant 0 : i32
    %c0_i32_1 = arith.constant 0 : i32
    return %arg0, %c0_i32, %c0_i32_0 : i32, i32, i32
  }
  func.func @transform_4(%arg0: i32) -> (i32, i32, i32, i32) {
    %c0_i32 = arith.constant 0 : i32
    %c0_i32_0 = arith.constant 0 : i32
    %c0_i32_1 = arith.constant 0 : i32
    %c0_i32_2 = arith.constant 0 : i32
    return %arg0, %c0_i32, %c0_i32_0, %c0_i32_1 : i32, i32, i32, i32
  }
  func.func @transform_5(%arg0: i32) -> (i32, i32, i32, i32) {
    %c0_i32 = arith.constant 0 : i32
    %c0_i32_0 = arith.constant 0 : i32
    %c0_i32_1 = arith.constant 0 : i32
    %c0_i32_2 = arith.constant 0 : i32
    return %arg0, %c0_i32, %c0_i32_0, %c0_i32_1 : i32, i32, i32, i32
  }
  func.func @transform_6(%arg0: i32) -> (i32, i32, i32, i32) {
    %c0_i32 = arith.constant 0 : i32
    %c0_i32_0 = arith.constant 0 : i32
    %c0_i32_1 = arith.constant 0 : i32
    %c0_i32_2 = arith.constant 0 : i32
    return %arg0, %c0_i32, %c0_i32_0, %c0_i32_1 : i32, i32, i32, i32
  }
  func.func @transform_7(%arg0: i32) -> (i32, i32, i32, i32) {
    %c0_i32 = arith.constant 0 : i32
    %c0_i32_0 = arith.constant 0 : i32
    %c0_i32_1 = arith.constant 0 : i32
    %c0_i32_2 = arith.constant 0 : i32
    return %arg0, %c0_i32, %c0_i32_0, %c0_i32_1 : i32, i32, i32, i32
  }
  func.func @transform_8(%arg0: i32) -> (i32, i32, i32, i32) {
    %c0_i32 = arith.constant 0 : i32
    %c0_i32_0 = arith.constant 0 : i32
    %c0_i32_1 = arith.constant 0 : i32
    %c0_i32_2 = arith.constant 0 : i32
    return %arg0, %c0_i32, %c0_i32_0, %c0_i32_1 : i32, i32, i32, i32
  }
  func.func @transform_9(%arg0: i32) -> (i32, i32, i32, i32) {
    %c0_i32 = arith.constant 0 : i32
    %c0_i32_0 = arith.constant 0 : i32
    %c0_i32_1 = arith.constant 0 : i32
    %c0_i32_2 = arith.constant 0 : i32
    return %arg0, %c0_i32, %c0_i32_0, %c0_i32_1 : i32, i32, i32, i32
  }
  func.func @transform_10(%arg0: i32) -> (i32, i32, i32) {
    %c0_i32 = arith.constant 0 : i32
    %c0_i32_0 = arith.constant 0 : i32
    %c0_i32_1 = arith.constant 0 : i32
    return %arg0, %c0_i32, %c0_i32_0 : i32, i32, i32
  }
}

</mosaic_0001>

<bundles_post_ra>
// kernel: simkgc_forward.1
= control target key start
LH: loop header
LB: loop body
LE: loop exit
PB: predicated region body
PF: predicated region fallthrough
CT: control target
= control target key end

     0   :  { %s5771_s13 = smov 0   ;;  %s6444_s0 = inlined_call_operand.vmem [shape: f32[2,32,32], index: 0, kind: input, shape index: {}]   ;;  %s6445_s1 = inlined_call_operand.vmem [shape: f32[2,4,8], index: 1, kind: input, shape index: {}]   ;;  %s6446_s2 = inlined_call_operand.vmem [shape: f32[2,4,32], index: 2, kind: input, shape index: {}]   ;;  %s6447_s3 = inlined_call_operand.vmem [shape: f32[2,2,32], index: 3, kind: input, shape index: {}]   ;;  %s6448_s4 = inlined_call_operand.vmem [shape: f32[2,2,32,96], index: 4, kind: input, shape index: {}]   ;;  %s6449_s5 = inlined_call_operand.vmem [shape: f32[2,2,1,96], index: 5, kind: input, shape index: {}]   ;;  %s6450_s6 = inlined_call_operand.vmem [shape: f32[2,2,32,32], index: 6, kind: input, shape index: {}]   ;;  %s6451_s7 = inlined_call_operand.vmem [shape: f32[2,2,32,64], index: 7, kind: input, shape index: {}]   ;;  %s6452_s8 = inlined_call_operand.vmem [shape: f32[2,2,64,32], index: 8, kind: input, shape index: {}]   ;;  %s6453_s9 = inlined_call_operand.vmem [shape: f32[2,2,8,64], index: 9, kind: input, shape index: {}]   ;;  %s6454_s10 = inlined_call_operand.vmem [shape: f32[2,4,32], index: 10, kind: output, shape index: {}]  }
   0x1 LB: > { %s4958_s14 = sadd.s32 4294967295, %s5706_s13   ;;  %p4962_p0 = scmp.ge.s32.totalorder %s5706_s13, 1  ;;  %s5706_s13 = sphi %s5771_s13, %s20_s13  }
   0x2   : > { %p398_p1 = scmp.lt.s32.totalorder %s5706_s13, 3 }
   0x4   : > { %p399_p2 = pnand %p4962_p0, %p398_p1 }
   0x5   : > { %p476_p3 = scmp.lt.s32.totalorder (!%p399_p2), %s4958_s14, 1  ;;  %s5710_s30 = smov (!%p399_p2), 96  }
   0x6   : > { %402 = sbr.rel (%p399_p2) target bundleno = 6689 (0x1a21), region = 60  ;;  %s5712_s17 = smov (!%p399_p2), 64  }
   0x7   : > { %s5714_s20 = smov (!%p399_p2), 112   ;;  %s5715_s25 = smov (!%p399_p2), 48  }
   0xb   : > { %s6456_s14 = smov (!%p476_p3, %s4958_s14), 1  ;;  %vm531_vm0 = vcmask 261120   ;;  %v585_v39 = vlaneseq  ;;  %vm5709_vm1 = vmmov 0   ;;  %vm763_vm2 = vcmask 130048  }
   0xc   : > { %s5096_s15 = sshll.u32 %s6456_s14, 5  ;;  %s5802_s19 = sshll.u32 %s6456_s14, 6  ;;  %vm1069_vm3 = vcmask 64512   ;;  %vm2509_vm4 = vcmask 523264   ;;  %vm4789_vm5 = vcmask 257024  }
   0xd   : > { %s480_s18 = scalar_lea.vmem %s6444_s0, %s5096_s15  ;;  %s5808_s22 = scalar_lea.vmem %s6448_s4, %s5802_s19  ;;  %v5815_v44 = vshrl.u32 %v585_v39, 7 }
   0xe   : > { %v527_v0 = vld [vmem:[%s480_s18] sm:$0xff]  ;;  %v529_v1 = vld [vmem:[%s480_s18 + $0x10] sm:$0xff]  ;;  %v528_v2 = vld [vmem:[%s480_s18 + $0x8] sm:$0xff]  ;;  %s4967_s23 = sshll.u32 %s6456_s14, 1  ;;  %s5903_s11 = sshll.u32 %s6456_s14, 2 }
   0xf   : > { %v532_v3 = vsel %vm531_vm0, %v527_v0, 0.0  ;;  %v538_v4 = vsel %vm531_vm0, %v529_v1, 0.0  ;;  %v530_v5 = vld [vmem:[%s480_s18 + $0x18] sm:$0xff]  ;;  %v535_v6 = vsel %vm531_vm0, %v528_v2, 0.0  ;;  %v629_v29 = vld [vmem:[%s5808_s22 + $0x10] sm:$0xff]  ;;  %v628_v30 = vld [vmem:[%s5808_s22 + $0x8] sm:$0xff]  ;;  %s492_s26 = scalar_lea.vmem %s6447_s3, %s4967_s23  ;;  %s5859_s29 = scalar_lea.vmem %s6449_s5, %s4967_s23 }
  0x10   : > { %533 = vadd.xlane.f32.xlu0 %v532_v3  ;;  %539 = vadd.xlane.f32.xlu1 %v538_v4  ;;  %v541_v7 = vsel %vm531_vm0, %v530_v5, 0.0  ;;  %v630_v28 = vld [vmem:[%s5808_s22 + $0x18] sm:$0xff]  ;;  %v627_v31 = vld [vmem:[%s5808_s22] sm:$0xff]  ;;  %v5823_v46 = vsub.s32 0, %v5815_v44  ;;  %v5826_v48 = vsub.s32 1, %v5815_v44  ;;  %v5708_v3 = vmov 0.0   ;;  %s484_s16 = scalar_lea.vmem %s6445_s1, %s5903_s11  ;;  %s5977_s24 = scalar_lea.vmem %s6450_s6, %s5802_s19 }
  0x11   : > { %5251 = vmatprep.subr.mxu0 %v630_v28  ;;  %v526_v47 = vld [vmem:[%s492_s26] sm:$0x3]  ;;  %5265 = vmatprep.subr.mxu1 %v5708_v3  ;;  %s5713_s18 = smov 80   ;;  %s5101_s26 = sshll.u32 %s6456_s14, 4 }
  0x12   : > { %5252 = vmatpush3.msra.mxu0 %v630_v28  ;;  %v588_v49 = vrot.slane %v526_v47, %v5823_v46  ;;  %v596_v52 = vrot.slane %v526_v47, %v5826_v48  ;;  %5267 = vmatprep.mubr.msk.f32.mxu1 %vm5709_vm1, %v5708_v3  ;;  %v4981_v4 = vld [vmem:[%s5859_s29] ss:$0 sm:$0xff]  ;;  %s6054_s12 = scalar_lea.vmem %s6453_s9, %s5101_s26  ;;  %s6081_s21 = scalar_lea.vmem %s6451_s7, %s5802_s19 }
  0x13   : > { %5253 = vmatprep.subr.mxu0 %v629_v29  ;;  %s5100_s19 = sshll.u32 %s6456_s14, 7 }
  0x14   : > { %536 = vadd.xlane.f32.xlu0 %v535_v6  ;;  %542 = vadd.xlane.f32.xlu1 %v541_v7  ;;  %s6113_s27 = scalar_lea.vmem %s6452_s8, %s5100_s19 }
  0x15   : > { %5254 = vmatpush3.msra.mxu0 %v629_v29 }
  0x16   : > { %5255 = vmatprep.subr.mxu0 %v628_v30 }
  0x17   : > { %5256 = vmatpush3.msra.mxu0 %v628_v30 }
  0x18   : > { %5257 = vmatprep.subr.mxu0 %v627_v31 }
  0x19   : > { %5258 = vmatpush3.msra.mxu0 %v627_v31 }
  0x1a   : > { %5290 = vmatprep.subr.mxu0 %v5708_v3 }
  0x99   : > { %v534_v8 = vpop.xlane.xlu0 %533  ;;  %v540_v9 = vpop.xlane.xlu1 %539 }
  0x9a   : > { %v545_v10 = vmul.f32 0.03125, %v534_v8  ;;  %v547_v11 = vmul.f32 0.03125, %v540_v9 }
  0x9c   : > { %v549_v12 = vsub.f32 %v527_v0, %v545_v10  ;;  %v5789_v13 = vsub.f32 %v529_v1, %v547_v11 }
  0x9d   : > { %v537_v14 = vpop.xlane.xlu0 %536  ;;  %v543_v15 = vpop.xlane.xlu1 %542 }
  0x9e   : > { %v546_v16 = vmul.f32 0.03125, %v537_v14  ;;  %v548_v17 = vmul.f32 0.03125, %v543_v15  ;;  %v553_v18 = vmul.f32 %v549_v12, %v549_v12  ;;  %v555_v19 = vmul.f32 %v5789_v13, %v5789_v13 }
  0xa0   : > { %v550_v20 = vsub.f32 %v528_v2, %v546_v16  ;;  %v5793_v21 = vsub.f32 %v530_v5, %v548_v17  ;;  %v557_v22 = vsel %vm531_vm0, %v553_v18, 0.0  ;;  %v563_v23 = vsel %vm531_vm0, %v555_v19, 0.0 }
  0xa1   : > { %558 = vadd.xlane.f32.xlu0 %v557_v22  ;;  %v5711_v17 = vmov 1966171168  }
  0xa2   : > { %v554_v24 = vmul.f32 %v550_v20, %v550_v20  ;;  %v556_v25 = vmul.f32 %v5793_v21, %v5793_v21  ;;  %v612_v18 = vunpack.c.l.s4 %v5711_v17 }
  0xa4   : > { %v560_v26 = vsel %vm531_vm0, %v554_v24, 0.0  ;;  %v566_v27 = vsel %vm531_vm0, %v556_v25, 0.0  ;;  %v613_v19 = vunpack.c.0.s8 %v612_v18 }
  0xa5   : > { %564 = vadd.xlane.f32.xlu0 %v563_v23  ;;  %561 = vadd.xlane.f32.xlu1 %v560_v26 }
  0xa9   : > { %567 = vadd.xlane.f32.xlu1 %v566_v27 }
 0x12a   : > { %v559_v32 = vpop.xlane.xlu0 %558 }
 0x12b   : > { %v569_v33 = vmul.f32 0.03125, %v559_v32 }
 0x12d   : > { %v573_v34 = vadd.f32 1e-12, %v569_v33 }
 0x12e   : > { %v562_v35 = vpop.xlane.xlu1 %561  ;;  %v565_v36 = vpop.xlane.xlu0 %564 }
 0x12f   : > { %5578 = vrsqrt.f32 %v573_v34  ;;  %v570_v37 = vmul.f32 0.03125, %v562_v35  ;;  %v571_v38 = vmul.f32 0.03125, %v565_v36 }
 0x131   : > { %v574_v40 = vadd.f32 1e-12, %v570_v37  ;;  %v575_v41 = vadd.f32 1e-12, %v571_v38 }
 0x132   : > { %v568_v42 = vpop.xlane.xlu1 %567 }
 0x133   : > { %5580 = vrsqrt.f32 %v574_v40  ;;  %v572_v43 = vmul.f32 0.03125, %v568_v42 }
 0x134   : > { %5582 = vrsqrt.f32 %v575_v41 }
 0x135   : > { %v576_v45 = vadd.f32 1e-12, %v572_v43 }
 0x137   : > { %5584 = vrsqrt.f32 %v576_v45 }
 0x13c   : > { %v5579_v50 = vpop.eup %5578 }
 0x13d   : > { %v581_v51 = vmul.f32 %v5579_v50, %v549_v12 }
 0x13f   : > { %v589_v53 = vmul.f32 %v588_v49, %v581_v51 }
 0x140   : > { %v5581_v54 = vpop.eup %5580 }
 0x141   : > { %v5583_v55 = vpop.eup %5582  ;;  %v5830_v56 = vadd.f32 %v596_v52, %v589_v53  ;;  %v582_v57 = vmul.f32 %v5581_v54, %v550_v20  ;;  %v616_v20 = vsub.s32 %v613_v19, %v5815_v44 }
 0x142   : > { %v583_v58 = vmul.f32 %v5583_v55, %v5789_v13 }
 0x143   : > { %5259 = vmatprep.mubr.msk.f32.mxu0 %vm531_vm0, %v5830_v56  ;;  %v590_v59 = vmul.f32 %v588_v49, %v582_v57 }
 0x144   : > { %v5585_v60 = vpop.eup %5584  ;;  %v591_v61 = vmul.f32 %v588_v49, %v583_v58 }
 0x145   : > { %v5835_v62 = vadd.f32 %v596_v52, %v590_v59  ;;  %v584_v63 = vmul.f32 %v5585_v60, %v5793_v21  ;;  %v4980_v21 = vld.sshfl [vmem:[%s484_s16] sm:$0x33 pattern:$0x75316420] }
 0x146   : > { %v5838_v0 = vadd.f32 %v596_v52, %v591_v61  ;;  %v617_v22 = vrot.slane %v4980_v21, %v616_v20  ;;  %v610_v23 = vcombine.high %v4980_v21, %v4980_v21 }
 0x147   : > { %5260 = vmatmul.mubr.msk.f32.vlgmr.msra.gmra.mxu0 %vm531_vm0, %v5835_v62  ;;  %v592_v1 = vmul.f32 %v588_v49, %v584_v63 }
 0x148   : > { %5262 = vmatprep.mubr.msk.f32.mxu0 %vm531_vm0, %v5838_v0  ;;  %v5911_v24 = vrot.slane %v617_v22, %v5823_v46  ;;  %v624_v25 = vrot.slane %v610_v23, %v616_v20  ;;  %v625_v29 = vcombine.high %v617_v22, %v617_v22 }
 0x149   : > { %v5844_v2 = vadd.f32 %v596_v52, %v592_v1 }
 0x14a   : > { %v5915_v28 = vrot.slane %v624_v25, %v5823_v46  ;;  %v5920_v34 = vrot.slane %v625_v29, %v5823_v46  ;;  %v626_v35 = vcombine.high %v624_v25, %v624_v25 }
 0x14b   : > { %5263 = vmatmul.mubr.msk.f32.gmra.mxu0 %vm531_vm0, %v5844_v2 }
 0x14c   : > { %5292 = vmatprep.mubr.msk.f32.mxu0 %vm5709_vm1, %v5708_v3  ;;  %v5925_v40 = vrot.slane %v626_v35, %v5823_v46 }
 0x207   : > { %v5261_v5 = vpop.f32.mrf.mxu0 }
 0x208   : > { %v5862_v6 = vadd.f32 %v5261_v5, %v4981_v4 }
 0x209   : > { %v721_v7 = vpop.f32.mrf.mxu0 }
 0x20a   : > { %v5864_v8 = vadd.f32 %v4981_v4, %v721_v7  ;;  %839 = vrot.lane.b32.xlu1 %v5862_v6, %s5710_s30 }
 0x20b   : > { %v5264_v9 = vpop.f32.mrf.mxu0 }
 0x20c   : > { %761 = vrot.lane.b32.xlu0 %v5864_v8, %s5710_s30  ;;  %v5874_v12 = vadd.f32 %v5264_v9, %v4981_v4 }
 0x20d   : > { %v731_v10 = vpop.f32.mrf.mxu0 }
 0x20e   : > { %v5870_v11 = vadd.f32 %v4981_v4, %v731_v10 }
 0x210   : > { %916 = vrot.lane.b32.xlu1 %v5870_v11, %s5710_s30 }
 0x214   : > { %993 = vrot.lane.b32.xlu1 %v5874_v12, %s5710_s30 }
 0x27c   : > { %v840_v14 = vpop.permute.xlu1 %839 }
 0x27e   : > { %v762_v13 = vpop.permute.xlu0 %761 }
 0x27f   : > { %5266 = vmatpush3.xpose.msk.msra.mxu1 %vm763_vm2, %v762_v13 }
 0x280   : > { %5270 = vmatprep.subr.mxu1 %v5708_v3 }
 0x282   : > { %5268 = vmatmul.mubr.msk.f32.vlgmr.msra.gmra.mxu1 %vm763_vm2, %v5864_v8  ;;  %v917_v15 = vpop.permute.xlu1 %916 }
 0x283   : > { %5271 = vmatpush3.xpose.msk.msra.mxu1 %vm763_vm2, %v840_v14  ;;  %5272 = vmatprep.mubr.msk.f32.mxu1 %vm5709_vm1, %v5708_v3 }
 0x284   : > { %5275 = vmatprep.subr.mxu1 %v5708_v3 }
 0x286   : > { %5273 = vmatmul.mubr.msk.f32.vlgmr.msra.gmra.mxu1 %vm763_vm2, %v5862_v6  ;;  %v994_v16 = vpop.permute.xlu1 %993 }
 0x287   : > { %5276 = vmatpush3.xpose.msk.msra.mxu1 %vm763_vm2, %v917_v15  ;;  %5277 = vmatprep.mubr.msk.f32.mxu1 %vm5709_vm1, %v5708_v3 }
 0x288   : > { %5280 = vmatprep.subr.mxu1 %v5708_v3 }
 0x28a   : > { %5278 = vmatmul.mubr.msk.f32.vlgmr.msra.gmra.mxu1 %vm763_vm2, %v5870_v11 }
 0x28b   : > { %5281 = vmatpush3.xpose.msk.msra.mxu1 %vm763_vm2, %v994_v16  ;;  %5282 = vmatprep.mubr.msk.f32.mxu1 %vm5709_vm1, %v5708_v3 }
 0x28c   : > { %5285 = vmatprep.subr.mxu1 %v5708_v3 }
 0x28e   : > { %5283 = vmatmul.mubr.msk.f32.vlgmr.msra.gmra.mxu1 %vm763_vm2, %v5874_v12 }
 0x28f   : > { %5287 = vmatprep.mubr.msk.f32.mxu1 %vm5709_vm1, %v5708_v3 }
 0x342   : > { %v834_v26 = vpop.f32.mrf.mxu1 }
 0x343   : > { %v835_v27 = vadd.f32 %v834_v26, %v5911_v24 }
 0x344   : > { %v5269_v30 = vpop.f32.mrf.mxu1 }
 0x345   : > { %v1070_v31 = vsel %vm1069_vm3, %v835_v27, -inf }
 0x346   : > { %1071 = vmax.xlane.f32.xlu0 %v1070_v31  ;;  %v911_v32 = vpop.f32.mrf.mxu1 }
 0x347   : > { %v912_v33 = vadd.f32 %v911_v32, %v5915_v28 }
 0x348   : > { %v5274_v36 = vpop.f32.mrf.mxu1 }
 0x349   : > { %v1073_v37 = vsel %vm1069_vm3, %v912_v33, -inf }
 0x34a   : > { %1074 = vmax.xlane.f32.xlu1 %v1073_v37  ;;  %v988_v38 = vpop.f32.mrf.mxu1  ;;  %v633_v37 = vld [vmem:[%s5977_s24 + $0x8] sm:$0xff] }
 0x34b   : > { %v989_v39 = vadd.f32 %v988_v38, %v5920_v34 }
 0x34c   : > { %v5279_v41 = vpop.f32.mrf.mxu1 }
 0x34d   : > { %v1076_v42 = vsel %vm1069_vm3, %v989_v39, -inf  ;;  %v632_v41 = vld [vmem:[%s5977_s24] sm:$0xff] }
 0x34e   : > { %1077 = vmax.xlane.f32.xlu0 %v1076_v42  ;;  %v1065_v43 = vpop.f32.mrf.mxu1 }
 0x34f   : > { %v1066_v45 = vadd.f32 %v1065_v43, %v5925_v40 }
 0x350   : > { %v5284_v47 = vpop.f32.mrf.mxu1 }
 0x351   : > { %v1079_v49 = vsel %vm1069_vm3, %v1066_v45, -inf }
 0x352   : > { %1080 = vmax.xlane.f32.xlu0 %v1079_v49 }
 0x3cf   : > { %v1072_v50 = vpop.xlane.xlu0 %1071 }
 0x3d0   : > { %v1082_v51 = vsub.f32 %v835_v27, %v1072_v50 }
 0x3d2   : > { %v1086_v52 = vmul.f32 1.442695, %v1082_v51 }
 0x3d3   : > { %v1075_v53 = vpop.xlane.xlu1 %1074 }
 0x3d4   : > { %5586 = vpow2.f32 %v1086_v52  ;;  %v1083_v54 = vsub.f32 %v912_v33, %v1075_v53 }
 0x3d6   : > { %v1088_v55 = vmul.f32 1.442695, %v1083_v54 }
 0x3d7   : > { %v1078_v57 = vpop.xlane.xlu0 %1077 }
 0x3d8   : > { %5588 = vpow2.f32 %v1088_v55  ;;  %v1084_v58 = vsub.f32 %v989_v39, %v1078_v57 }
 0x3da   : > { %v1090_v59 = vmul.f32 1.442695, %v1084_v58 }
 0x3db   : > { %v1081_v7 = vpop.xlane.xlu0 %1080 }
 0x3dc   : > { %5590 = vpow2.f32 %v1090_v59  ;;  %v1085_v9 = vsub.f32 %v1066_v45, %v1081_v7 }
 0x3de   : > { %v1092_v10 = vmul.f32 1.442695, %v1085_v9 }
 0x3e0   : > { %5592 = vpow2.f32 %v1092_v10 }
 0x3e1   : > { %v5587_v60 = vpop.eup %5586 }
 0x3e2   : > { %v1094_v61 = vsel %vm1069_vm3, %v5587_v60, 0.0 }
 0x3e3   : > { %1095 = vadd.xlane.f32.xlu0 %v1094_v61 }
 0x3e5   : > { %v5589_v63 = vpop.eup %5588 }
 0x3e6   : > { %v1097_v1 = vsel %vm1069_vm3, %v5589_v63, 0.0 }
 0x3e7   : > { %1098 = vadd.xlane.f32.xlu1 %v1097_v1 }
 0x3e9   : > { %v5591_v4 = vpop.eup %5590 }
 0x3ea   : > { %v1100_v5 = vsel %vm1069_vm3, %v5591_v4, 0.0 }
 0x3eb   : > { %1101 = vadd.xlane.f32.xlu0 %v1100_v5 }
 0x3ed   : > { %v5593_v13 = vpop.eup %5592 }
 0x3ee   : > { %v1103_v14 = vsel %vm1069_vm3, %v5593_v13, 0.0 }
 0x3f8   : > { %1190 = vrot.lane.b32.xlu1 %v5862_v6, %s5712_s17 }
 0x3fc   : > { %1266 = vrot.lane.b32.xlu1 %v5870_v11, %s5712_s17 }
 0x401   : > { %1114 = vrot.lane.b32.xlu0 %v5864_v8, %s5712_s17 }
 0x405   : > { %1525 = vrot.lane.b32.xlu0 %v5864_v8, %s5713_s18 }
 0x409   : > { %1603 = vrot.lane.b32.xlu0 %v5862_v6, %s5713_s18 }
 0x40d   : > { %1681 = vrot.lane.b32.xlu0 %v5870_v11, %s5713_s18 }
 0x411   : > { %1679 = vrot.lane.b32.xlu0 %v5870_v11, %s5714_s20 }
 0x420   : > { %1104 = vadd.xlane.f32.xlu1 %v1103_v14 }
 0x431   : > { %1342 = vrot.lane.b32.xlu1 %v5874_v12, %s5712_s17 }
 0x435   : > { %1523 = vrot.lane.b32.xlu1 %v5864_v8, %s5714_s20 }
 0x439   : > { %1601 = vrot.lane.b32.xlu1 %v5862_v6, %s5714_s20 }
 0x43d   : > { %1759 = vrot.lane.b32.xlu1 %v5874_v12, %s5713_s18 }
 0x441   : > { %1757 = vrot.lane.b32.xlu1 %v5874_v12, %s5714_s20 }
 0x46c   : > { %v1096_v15 = vpop.xlane.xlu0 %1095 }
 0x46d   : > { %5594 = vrcp.f32 %v1096_v15 }
 0x470   : > { %v1099_v16 = vpop.xlane.xlu1 %1098 }
 0x471   : > { %5596 = vrcp.f32 %v1099_v16 }
 0x474   : > { %v1191_v17 = vpop.permute.xlu1 %1190  ;;  %v1102_v18 = vpop.xlane.xlu0 %1101 }
 0x475   : > { %5598 = vrcp.f32 %v1102_v18  ;;  %5291 = vmatpush3.msra.mxu0 %v1191_v17 }
 0x476   : > { %5300 = vmatprep.subr.mxu0 %v5708_v3 }
 0x478   : > { %v1115_v19 = vpop.permute.xlu0 %1114  ;;  %v1267_v22 = vpop.permute.xlu1 %1266 }
 0x479   : > { %5286 = vmatpush3.msra.mxu1 %v1115_v19 }
 0x47a   : > { %v5595_v20 = vpop.eup %5594  ;;  %5295 = vmatprep.subr.mxu1 %v5708_v3 }
 0x47b   : > { %v1110_v21 = vmul.f32 %v5595_v20, %v5587_v60 }
 0x47c   : > { %v1526_v33 = vpop.permute.xlu0 %1525 }
 0x47d   : > { %5288 = vmatmul.mubr.msk.f32.vlgmr.msra.gmra.mxu1 %vm1069_vm3, %v1110_v21 }
 0x47e   : > { %v5597_v23 = vpop.eup %5596  ;;  %5296 = vmatpush3.msra.mxu1 %v1267_v22  ;;  %5297 = vmatprep.mubr.msk.f32.mxu1 %vm5709_vm1, %v5708_v3 }
 0x47f   : > { %v1111_v25 = vmul.f32 %v5597_v23, %v5589_v63  ;;  %5305 = vmatprep.subr.mxu1 %v633_v37 }
 0x480   : > { %v1604_v38 = vpop.permute.xlu0 %1603 }
 0x481   : > { %5293 = vmatmul.mubr.msk.f32.vlgmr.msra.gmra.mxu0 %vm1069_vm3, %v1111_v25 }
 0x482   : > { %v5599_v26 = vpop.eup %5598  ;;  %5302 = vmatprep.mubr.msk.f32.mxu0 %vm5709_vm1, %v5708_v3 }
 0x483   : > { %v1112_v27 = vmul.f32 %v5599_v26, %v5591_v4 }
 0x484   : > { %v1682_v49 = vpop.permute.xlu0 %1681 }
 0x485   : > { %5298 = vmatmul.mubr.msk.f32.vlgmr.msra.gmra.mxu1 %vm1069_vm3, %v1112_v27 }
 0x486   : > { %5306 = vmatpush3.msra.mxu1 %v633_v37 }
 0x487   : > { %5307 = vmatprep.subr.mxu1 %v632_v41 }
 0x488   : > { %5308 = vmatpush3.msra.mxu1 %v632_v41  ;;  %v1680_v55 = vpop.permute.xlu0 %1679 }
 0x489   : > { %5325 = vmatprep.subr.mxu1 %v5708_v3 }
 0x4a9   : > { %v1105_v29 = vpop.xlane.xlu1 %1104 }
 0x4aa   : > { %5600 = vrcp.f32 %v1105_v29 }
 0x4ad   : > { %v1343_v30 = vpop.permute.xlu1 %1342 }
 0x4ae   : > { %5301 = vmatpush3.msra.mxu0 %v1343_v30 }
 0x4af   : > { %5315 = vmatprep.subr.mxu0 %v5708_v3 }
 0x4b1   : > { %v1524_v31 = vpop.permute.xlu1 %1523 }
 0x4b5   : > { %v1602_v36 = vpop.permute.xlu1 %1601 }
 0x4b7   : > { %v5601_v32 = vpop.eup %5600 }
 0x4b8   : > { %v1113_v35 = vmul.f32 %v5601_v32, %v5593_v13 }
 0x4b9   : > { %v1760_v39 = vpop.permute.xlu1 %1759 }
 0x4ba   : > { %5303 = vmatmul.mubr.msk.f32.vlgmr.msra.gmra.mxu0 %vm1069_vm3, %v1113_v35 }
 0x4bb   : > { %5316 = vmatpush3.xpose.msk.msra.mxu0 %vm763_vm2, %v1526_v33  ;;  %5317 = vmatprep.mubr.msk.f32.mxu0 %vm5709_vm1, %v5708_v3 }
 0x4bc   : > { %5320 = vmatprep.subr.mxu0 %v5708_v3 }
 0x4bd   : > { %v1758_v42 = vpop.permute.xlu1 %1757 }
 0x4be   : > { %5318 = vmatmul.mubr.msk.f32.vlgmr.msra.gmra.mxu0 %vm763_vm2, %v1524_v31 }
 0x4bf   : > { %5321 = vmatpush3.xpose.msk.msra.mxu0 %vm763_vm2, %v1604_v38  ;;  %5322 = vmatprep.mubr.msk.f32.mxu0 %vm5709_vm1, %v5708_v3 }
 0x4c0   : > { %5330 = vmatprep.subr.mxu0 %v5708_v3 }
 0x4c2   : > { %5323 = vmatmul.mubr.msk.f32.vlgmr.msra.gmra.mxu0 %vm763_vm2, %v1602_v36 }
 0x4c3   : > { %5331 = vmatpush3.xpose.msk.msra.mxu0 %vm763_vm2, %v1760_v39  ;;  %5332 = vmatprep.mubr.msk.f32.mxu0 %vm5709_vm1, %v5708_v3 }
 0x4c4   : > { %5340 = vmatprep.subr.mxu0 %v5708_v3 }
 0x4c6   : > { %5333 = vmatmul.mubr.msk.f32.vlgmr.msra.gmra.mxu0 %vm763_vm2, %v1758_v42 }
 0x4c7   : > { %5342 = vmatprep.mubr.msk.f32.mxu0 %vm5709_vm1, %v5708_v3 }
 0x53d   : > { %v1186_v43 = vpop.f32.mrf.mxu1 }
 0x53e   : > { %5309 = vmatprep.mubr.msk.f32.mxu1 %vm763_vm2, %v1186_v43 }
 0x53f   : > { %v5289_v45 = vpop.f32.mrf.mxu1 }
 0x541   : > { %v1262_v47 = vpop.f32.mrf.mxu0 }
 0x542   : > { %5310 = vmatmul.mubr.msk.f32.vlgmr.msra.gmra.mxu1 %vm763_vm2, %v1262_v47 }
 0x543   : > { %5326 = vmatpush3.xpose.msk.msra.mxu1 %vm763_vm2, %v1682_v49  ;;  %v5294_v50 = vpop.f32.mrf.mxu0 }
 0x544   : > { %5335 = vmatprep.subr.mxu1 %v5708_v3 }
 0x545   : > { %v1338_v51 = vpop.f32.mrf.mxu1 }
 0x546   : > { %5312 = vmatprep.mubr.msk.f32.mxu1 %vm763_vm2, %v1338_v51 }
 0x547   : > { %v5299_v52 = vpop.f32.mrf.mxu1 }
 0x57a   : > { %v1414_v53 = vpop.f32.mrf.mxu0 }
 0x57b   : > { %5313 = vmatmul.mubr.msk.f32.gmra.mxu1 %vm763_vm2, %v1414_v53 }
 0x57c   : > { %v5304_v54 = vpop.f32.mrf.mxu0  ;;  %5327 = vmatprep.mubr.msk.f32.mxu1 %vm5709_vm1, %v5708_v3 }
 0x57e   : > { %v1597_v57 = vpop.f32.mrf.mxu0 }
 0x57f   : > { %v1598_v58 = vadd.f32 %v1597_v57, %v5911_v24  ;;  %5328 = vmatmul.mubr.msk.f32.vlgmr.msra.gmra.mxu1 %vm763_vm2, %v1680_v55 }
 0x580   : > { %v5319_v59 = vpop.f32.mrf.mxu0  ;;  %5337 = vmatprep.mubr.msk.f32.mxu1 %vm5709_vm1, %v5708_v3 }
 0x581   : > { %v1835_v60 = vsel %vm1069_vm3, %v1598_v58, -inf }
 0x582   : > { %1836 = vmax.xlane.f32.xlu0 %v1835_v60  ;;  %v1675_v61 = vpop.f32.mrf.mxu0 }
 0x583   : > { %v1676_v63 = vadd.f32 %v1675_v61, %v5915_v28  ;;  %v635_v61 = vld [vmem:[%s5977_s24 + $0x18] sm:$0xff] }
 0x584   : > { %v5324_v1 = vpop.f32.mrf.mxu0 }
 0x585   : > { %v1838_v4 = vsel %vm1069_vm3, %v1676_v63, -inf }
 0x586   : > { %1839 = vmax.xlane.f32.xlu1 %v1838_v4  ;;  %v1831_v5 = vpop.f32.mrf.mxu0 }
 0x587   : > { %v1832_v27 = vadd.f32 %v1831_v5, %v5925_v40 }
 0x588   : > { %v5334_v7 = vpop.f32.mrf.mxu0 }
 0x589   : > { %v1844_v30 = vsel %vm1069_vm3, %v1832_v27, -inf }
 0x602   : > { %v6011_v18 = vpop.f32.mrf.mxu1 }
 0x604   : > { %v6013_v20 = vpop.f32.mrf.mxu1 }
 0x60b   : > { %v1837_v16 = vpop.xlane.xlu0 %1836 }
 0x60c   : > { %v1847_v17 = vsub.f32 %v1598_v58, %v1837_v16 }
 0x60e   : > { %v1851_v19 = vmul.f32 1.442695, %v1847_v17 }
 0x60f   : > { %v1840_v9 = vpop.xlane.xlu1 %1839 }
 0x610   : > { %v1848_v10 = vsub.f32 %v1676_v63, %v1840_v9  ;;  %v634_v63 = vld [vmem:[%s5977_s24 + $0x10] sm:$0xff] }
 0x612   : > { %v1853_v13 = vmul.f32 1.442695, %v1848_v10 }
 0x614   : > { %5602 = vpow2.f32 %v1853_v13 }
 0x615   : > { %5604 = vpow2.f32 %v1851_v19 }
 0x621   : > { %v5603_v14 = vpop.eup %5602 }
 0x622   : > { %v1862_v15 = vsel %vm1069_vm3, %v5603_v14, 0.0  ;;  %v5605_v31 = vpop.eup %5604 }
 0x623   : > { %1863 = vadd.xlane.f32.xlu1 %v1862_v15  ;;  %v1859_v32 = vsel %vm1069_vm3, %v5605_v31, 0.0  ;;  %v6057_v15 = vld [vmem:[%s6054_s12] sm:$0xff] }
 0x624   : > { %v1518_v16 = vrot.slane %v6057_v15, %v5823_v46 }
 0x626   : > { %v1520_v17 = vadd.f32 %v6011_v18, %v1518_v16 }
 0x63b   : > { %v6015_v21 = vpop.f32.mrf.mxu1 }
 0x63d   : > { %v6017_v22 = vpop.f32.mrf.mxu1 }
 0x63e   : > { %v1521_v18 = vadd.f32 %v1518_v16, %v6017_v22 }
 0x63f   : > { %v1753_v23 = vpop.f32.mrf.mxu1 }
 0x640   : > { %v1754_v25 = vadd.f32 %v1753_v23, %v5920_v34  ;;  %v1519_v23 = vadd.f32 %v1518_v16, %v6013_v20 }
 0x641   : > { %v5329_v26 = vpop.f32.mrf.mxu1 }
 0x642   : > { %v1841_v29 = vsel %vm1069_vm3, %v1754_v25, -inf }
 0x643   : > { %1842 = vmax.xlane.f32.xlu0 %v1841_v29 }
 0x647   : > { %1845 = vmax.xlane.f32.xlu0 %v1844_v30 }
 0x64b   : > { %1860 = vadd.xlane.f32.xlu0 %v1859_v32 }
 0x6ac   : > { %v1864_v49 = vpop.xlane.xlu1 %1863 }
 0x6cc   : > { %v1843_v33 = vpop.xlane.xlu0 %1842 }
 0x6cd   : > { %v1849_v35 = vsub.f32 %v1754_v25, %v1843_v33 }
 0x6cf   : > { %v1855_v36 = vmul.f32 1.442695, %v1849_v35  ;;  %v1522_v35 = vadd.f32 %v6015_v21, %v1518_v16 }
 0x6d0   : > { %v1846_v37 = vpop.xlane.xlu0 %1845 }
 0x6d1   : > { %5606 = vpow2.f32 %v1855_v36  ;;  %v1850_v38 = vsub.f32 %v1832_v27, %v1846_v37 }
 0x6d3   : > { %v1857_v39 = vmul.f32 1.442695, %v1850_v38 }
 0x6d4   : > { %v1861_v47 = vpop.xlane.xlu0 %1860 }
 0x6d5   : > { %5608 = vpow2.f32 %v1857_v39 }
 0x6d6   : > { %5610 = vrcp.f32 %v1861_v47 }
 0x6d7   : > { %5612 = vrcp.f32 %v1864_v49 }
 0x6de   : > { %v5607_v41 = vpop.eup %5606 }
 0x6df   : > { %v1865_v42 = vsel %vm1069_vm3, %v5607_v41, 0.0 }
 0x6e0   : > { %1866 = vadd.xlane.f32.xlu0 %v1865_v42 }
 0x6e2   : > { %v5609_v43 = vpop.eup %5608 }
 0x6e3   : > { %v1868_v45 = vsel %vm1069_vm3, %v5609_v43, 0.0  ;;  %v5611_v51 = vpop.eup %5610 }
 0x6e4   : > { %1869 = vadd.xlane.f32.xlu1 %v1868_v45  ;;  %v1875_v54 = vmul.f32 %v5611_v51, %v5605_v31 }
 0x6f5   : > { %1955 = vrot.lane.b32.xlu1 %v5862_v6, %s5715_s25  ;;  %v5613_v6 = vpop.eup %5612 }
 0x6f6   : > { %1879 = vrot.lane.b32.xlu0 %v5864_v8, %s5715_s25 }
 0x6f9   : > { %2031 = vrot.lane.b32.xlu1 %v5870_v11, %s5715_s25  ;;  %v1876_v11 = vmul.f32 %v5613_v6, %v5603_v14 }
 0x6fd   : > { %2107 = vrot.lane.b32.xlu1 %v5874_v12, %s5715_s25 }
 0x769   : > { %v1867_v50 = vpop.xlane.xlu0 %1866 }
 0x76a   : > { %5614 = vrcp.f32 %v1867_v50 }
 0x76d   : > { %v1870_v52 = vpop.xlane.xlu1 %1869  ;;  %v1880_v53 = vpop.permute.xlu0 %1879 }
 0x76e   : > { %5616 = vrcp.f32 %v1870_v52  ;;  %5336 = vmatpush3.msra.mxu1 %v1880_v53 }
 0x76f   : > { %5338 = vmatmul.mubr.msk.f32.vlgmr.msra.gmra.mxu1 %vm1069_vm3, %v1875_v54  ;;  %5345 = vmatprep.subr.mxu1 %v5708_v3 }
 0x770   : > { %5347 = vmatprep.mubr.msk.f32.mxu1 %vm5709_vm1, %v5708_v3 }
 0x771   : > { %v1956_v8 = vpop.permute.xlu1 %1955 }
 0x772   : > { %5341 = vmatpush3.msra.mxu0 %v1956_v8 }
 0x773   : > { %5343 = vmatmul.mubr.msk.f32.vlgmr.msra.gmra.mxu0 %vm1069_vm3, %v1876_v11  ;;  %5350 = vmatprep.subr.mxu0 %v5708_v3 }
 0x774   : > { %5352 = vmatprep.mubr.msk.f32.mxu0 %vm5709_vm1, %v5708_v3 }
 0x775   : > { %v2032_v12 = vpop.permute.xlu1 %2031 }
 0x776   : > { %5346 = vmatpush3.msra.mxu1 %v2032_v12 }
 0x777   : > { %v5615_v55 = vpop.eup %5614  ;;  %5355 = vmatprep.subr.mxu1 %v635_v61 }
 0x778   : > { %v1877_v57 = vmul.f32 %v5615_v55, %v5607_v41 }
 0x779   : > { %v2108_v58 = vpop.permute.xlu1 %2107 }
 0x77a   : > { %5348 = vmatmul.mubr.msk.f32.vlgmr.msra.gmra.mxu1 %vm1069_vm3, %v1877_v57  ;;  %5351 = vmatpush3.msra.mxu0 %v2108_v58  ;;  %v2359_v57 = vld [vmem:[%s6081_s21 + $0x18] sm:$0xff]  ;;  %v2358_v58 = vld [vmem:[%s6081_s21 + $0x10] sm:$0xff] }
 0x77b   : > { %v5617_v59 = vpop.eup %5616  ;;  %5356 = vmatpush3.msra.mxu1 %v635_v61  ;;  %5365 = vmatprep.subr.mxu0 %v2359_v57 }
 0x77c   : > { %v1878_v60 = vmul.f32 %v5617_v59, %v5609_v43  ;;  %5357 = vmatprep.subr.mxu1 %v634_v63  ;;  %v2357_v59 = vld [vmem:[%s6081_s21 + $0x8] sm:$0xff] }
 0x77d   : > { %5358 = vmatpush3.msra.mxu1 %v634_v63 }
 0x77e   : > { %5353 = vmatmul.mubr.msk.f32.vlgmr.msra.gmra.mxu0 %vm1069_vm3, %v1878_v60  ;;  %v2356_v60 = vld [vmem:[%s6081_s21] sm:$0xff] }
 0x77f   : > { %5366 = vmatpush3.msra.mxu0 %v2359_v57 }
 0x780   : > { %5367 = vmatprep.subr.mxu0 %v2358_v58 }
 0x781   : > { %5368 = vmatpush3.msra.mxu0 %v2358_v58 }
 0x782   : > { %5369 = vmatprep.subr.mxu0 %v2357_v59 }
 0x783   : > { %5370 = vmatpush3.msra.mxu0 %v2357_v59 }
 0x784   : > { %5371 = vmatprep.subr.mxu0 %v2356_v60 }
 0x785   : > { %5372 = vmatpush3.msra.mxu0 %v2356_v60 }
 0x82f   : > { %v1951_v1 = vpop.f32.mrf.mxu1 }
 0x830   : > { %5359 = vmatprep.mubr.msk.f32.mxu1 %vm763_vm2, %v1951_v1 }
 0x831   : > { %v5339_v4 = vpop.f32.mrf.mxu1 }
 0x833   : > { %v2027_v5 = vpop.f32.mrf.mxu0 }
 0x834   : > { %5360 = vmatmul.mubr.msk.f32.vlgmr.msra.gmra.mxu1 %vm763_vm2, %v2027_v5 }
 0x835   : > { %v5344_v7 = vpop.f32.mrf.mxu0 }
 0x83a   : > { %v2103_v9 = vpop.f32.mrf.mxu1 }
 0x83b   : > { %5362 = vmatprep.mubr.msk.f32.mxu1 %vm763_vm2, %v2103_v9 }
 0x83c   : > { %v5349_v10 = vpop.f32.mrf.mxu1 }
 0x83e   : > { %v2179_v13 = vpop.f32.mrf.mxu0 }
 0x83f   : > { %5363 = vmatmul.mubr.msk.f32.gmra.mxu1 %vm763_vm2, %v2179_v13 }
 0x840   : > { %v5354_v14 = vpop.f32.mrf.mxu0 }
 0x8f4   : > { %v5361_v19 = vpop.f32.mrf.mxu1 }
 0x8f5   : > { %v2281_v25 = vadd.f32 %v5361_v19, %v1520_v17  ;;  %v2343_v19 = vrot.slane %v6057_v15, %v5826_v48 }
 0x8f6   : > { %v2261_v26 = vpop.f32.mrf.mxu1 }
 0x8f7   : > { %v2280_v27 = vadd.f32 %v2261_v26, %v1519_v23  ;;  %v2285_v29 = vadd.f32 %v2281_v25, %v5835_v62  ;;  %v2350_v23 = vsub.s32 2, %v5815_v44 }
 0x8f9   : > { %v2291_v30 = vsel %vm531_vm0, %v2285_v29, 0.0  ;;  %v2284_v31 = vadd.f32 %v2280_v27, %v5830_v56 }
 0x8fa   : > { %2292 = vadd.xlane.f32.xlu1 %v2291_v30  ;;  %v2351_v30 = vrot.slane %v6057_v15, %v2350_v23 }
 0x8fb   : > { %v2288_v32 = vsel %vm531_vm0, %v2284_v31, 0.0 }
 0x8fc   : > { %2289 = vadd.xlane.f32.xlu0 %v2288_v32 }
 0x8ff   : > { %v5364_v33 = vpop.f32.mrf.mxu1 }
 0x900   : > { %v2283_v20 = vadd.f32 %v5364_v33, %v1522_v35 }
 0x901   : > { %v2271_v36 = vpop.f32.mrf.mxu1 }
 0x902   : > { %v2282_v37 = vadd.f32 %v2271_v36, %v1521_v18  ;;  %v2287_v39 = vadd.f32 %v2283_v20, %v5844_v2 }
 0x904   : > { %v2286_v38 = vadd.f32 %v2282_v37, %v5838_v0  ;;  %v2297_v56 = vsel %vm531_vm0, %v2287_v39, 0.0 }
 0x906   : > { %v2294_v62 = vsel %vm531_vm0, %v2286_v38, 0.0 }
 0x907   : > { %2295 = vadd.xlane.f32.xlu0 %v2294_v62 }
 0x90b   : > { %2298 = vadd.xlane.f32.xlu0 %v2297_v56 }
 0x983   : > { %v2293_v41 = vpop.xlane.xlu1 %2292 }
 0x984   : > { %v2301_v42 = vmul.f32 0.03125, %v2293_v41  ;;  %v2504_v41 = vld [vmem:[%s6113_s27 + $0x38] sm:$0xff] }
 0x985   : > { %v2290_v43 = vpop.xlane.xlu0 %2289  ;;  %5379 = vmatprep.subr.mxu1 %v2504_v41 }
 0x986   : > { %v2305_v45 = vsub.f32 %v2285_v29, %v2301_v42  ;;  %v2300_v21 = vmul.f32 0.03125, %v2290_v43  ;;  %5380 = vmatpush3.msra.mxu1 %v2504_v41  ;;  %v2503_v42 = vld [vmem:[%s6113_s27 + $0x30] sm:$0xff]  ;;  %v2502_v43 = vld [vmem:[%s6113_s27 + $0x28] sm:$0xff] }
 0x987   : > { %5381 = vmatprep.subr.mxu1 %v2503_v42 }
 0x988   : > { %v2304_v47 = vsub.f32 %v2284_v31, %v2300_v21  ;;  %v2309_v22 = vmul.f32 %v2305_v45, %v2305_v45  ;;  %5382 = vmatpush3.msra.mxu1 %v2503_v42  ;;  %v2500_v21 = vld [vmem:[%s6113_s27 + $0x18] sm:$0xff] }
 0x989   : > { %5383 = vmatprep.subr.mxu1 %v2502_v43 }
 0x98a   : > { %v2315_v49 = vsel %vm531_vm0, %v2309_v22, 0.0  ;;  %v2308_v50 = vmul.f32 %v2304_v47, %v2304_v47  ;;  %5384 = vmatpush3.msra.mxu1 %v2502_v43  ;;  %v2498_v22 = vld [vmem:[%s6113_s27 + $0x8] sm:$0xff] }
 0x98b   : > { %2316 = vadd.xlane.f32.xlu1 %v2315_v49  ;;  %v2497_v49 = vld [vmem:[%s6113_s27] sm:$0xff] }
 0x98c   : > { %v2312_v0 = vsel %vm531_vm0, %v2308_v50, 0.0  ;;  %v2362_v50 = vsub.s32 6, %v5815_v44 }
 0x98d   : > { %2313 = vadd.xlane.f32.xlu0 %v2312_v0 }
 0x98e   : > { %v2363_v0 = vrot.slane %v6057_v15, %v2362_v50 }
 0x990   : > { %v2296_v2 = vpop.xlane.xlu0 %2295 }
 0x991   : > { %v2302_v51 = vmul.f32 0.03125, %v2296_v2 }
 0x993   : > { %v2306_v52 = vsub.f32 %v2286_v38, %v2302_v51 }
 0x994   : > { %v2299_v53 = vpop.xlane.xlu0 %2298 }
 0x995   : > { %v2303_v54 = vmul.f32 0.03125, %v2299_v53  ;;  %v2310_v6 = vmul.f32 %v2306_v52, %v2306_v52 }
 0x997   : > { %v2307_v8 = vsub.f32 %v2287_v39, %v2303_v54  ;;  %v2318_v11 = vsel %vm531_vm0, %v2310_v6, 0.0 }
 0x998   : > { %2319 = vadd.xlane.f32.xlu0 %v2318_v11 }
 0x999   : > { %v2311_v12 = vmul.f32 %v2307_v8, %v2307_v8 }
 0x99b   : > { %v2321_v55 = vsel %vm531_vm0, %v2311_v12, 0.0 }
 0x99c   : > { %2322 = vadd.xlane.f32.xlu1 %v2321_v55 }
 0xa14   : > { %v2317_v61 = vpop.xlane.xlu1 %2316 }
 0xa15   : > { %v2325_v63 = vmul.f32 0.03125, %v2317_v61 }
 0xa16   : > { %v2314_v1 = vpop.xlane.xlu0 %2313 }
 0xa17   : > { %v2329_v4 = vadd.f32 1e-12, %v2325_v63  ;;  %v2324_v5 = vmul.f32 0.03125, %v2314_v1 }
 0xa19   : > { %5618 = vrsqrt.f32 %v2329_v4  ;;  %v2328_v7 = vadd.f32 1e-12, %v2324_v5 }
 0xa1b   : > { %5620 = vrsqrt.f32 %v2328_v7 }
 0xa21   : > { %v2320_v9 = vpop.xlane.xlu0 %2319 }
 0xa22   : > { %v2326_v10 = vmul.f32 0.03125, %v2320_v9 }
 0xa24   : > { %v2330_v13 = vadd.f32 1e-12, %v2326_v10 }
 0xa25   : > { %v2323_v14 = vpop.xlane.xlu1 %2322 }
 0xa26   : > { %v5619_v16 = vpop.eup %5618  ;;  %5622 = vrsqrt.f32 %v2330_v13  ;;  %v2327_v17 = vmul.f32 0.03125, %v2323_v14 }
 0xa27   : > { %v2337_v25 = vmul.f32 %v5619_v16, %v2305_v45  ;;  %v2501_v45 = vld [vmem:[%s6113_s27 + $0x20] sm:$0xff] }
 0xa28   : > { %v5621_v26 = vpop.eup %5620  ;;  %v2331_v27 = vadd.f32 1e-12, %v2327_v17  ;;  %5385 = vmatprep.subr.mxu1 %v2501_v45 }
 0xa29   : > { %v2336_v29 = vmul.f32 %v5621_v26, %v2304_v47  ;;  %v2345_v31 = vmul.f32 %v2343_v19, %v2337_v25  ;;  %5386 = vmatpush3.msra.mxu1 %v2501_v45  ;;  %v2499_v47 = vld [vmem:[%s6113_s27 + $0x10] sm:$0xff] }
 0xa2a   : > { %5624 = vrsqrt.f32 %v2331_v27  ;;  %5387 = vmatprep.subr.mxu1 %v2500_v21 }
 0xa2b   : > { %v2344_v32 = vmul.f32 %v2343_v19, %v2336_v29  ;;  %v6095_v35 = vadd.f32 %v2351_v30, %v2345_v31  ;;  %5388 = vmatpush3.msra.mxu1 %v2500_v21  ;;  %v2507_v21 = vsub.s32 3, %v5815_v44 }
 0xa2c   : > { %5389 = vmatprep.subr.mxu1 %v2499_v47 }
 0xa2d   : > { %v6093_v33 = vadd.f32 %v2351_v30, %v2344_v32  ;;  %5390 = vmatpush3.msra.mxu1 %v2499_v47  ;;  %v2508_v47 = vrot.slane %v6057_v15, %v2507_v21 }
 0xa2e   : > { %5391 = vmatprep.subr.mxu1 %v2498_v22 }
 0xa2f   : > { %5373 = vmatprep.mubr.msk.f32.mxu0 %vm531_vm0, %v6093_v33  ;;  %5392 = vmatpush3.msra.mxu1 %v2498_v22 }
 0xa30   : > { %5374 = vmatmul.mubr.msk.f32.vlgmr.msra.gmra.mxu0 %vm531_vm0, %v6095_v35  ;;  %5393 = vmatprep.subr.mxu1 %v2497_v49 }
 0xa31   : > { %5394 = vmatpush3.msra.mxu1 %v2497_v49 }
 0xa32   : > { %5420 = vmatprep.subr.mxu1 %v5708_v3 }
 0xa33   : > { %v5623_v18 = vpop.eup %5622 }
 0xa34   : > { %v2338_v36 = vmul.f32 %v5623_v18, %v2306_v52 }
 0xa36   : > { %v2346_v20 = vmul.f32 %v2343_v19, %v2338_v36 }
 0xa37   : > { %v5625_v37 = vpop.eup %5624 }
 0xa38   : > { %v6101_v38 = vadd.f32 %v2351_v30, %v2346_v20  ;;  %v2339_v62 = vmul.f32 %v5625_v37, %v2307_v8 }
 0xa3a   : > { %5376 = vmatprep.mubr.msk.f32.mxu0 %vm531_vm0, %v6101_v38  ;;  %v2347_v39 = vmul.f32 %v2343_v19, %v2339_v62 }
 0xa3c   : > { %v6105_v56 = vadd.f32 %v2351_v30, %v2347_v39 }
 0xa3e   : > { %5377 = vmatmul.mubr.msk.f32.gmra.mxu0 %vm531_vm0, %v6105_v56 }
 0xaf0   : > { %v5375_v2 = vpop.f32.mrf.mxu0 }
 0xaf1   : > { %v2448_v51 = vadd.f32 %v5375_v2, %v2363_v0 }
 0xaf2   : > { %v2442_v52 = vpop.f32.mrf.mxu0 }
 0xaf3   : > { %v2462_v53 = vmul.f32 %v2448_v51, %v2448_v51  ;;  %v2443_v54 = vadd.f32 %v2442_v52, %v2363_v0 }
 0xaf5   : > { %v2466_v6 = vmul.f32 %v2462_v53, %v2448_v51  ;;  %v2461_v8 = vmul.f32 %v2443_v54, %v2443_v54 }
 0xaf7   : > { %v2470_v11 = vmul.f32 0.044715, %v2466_v6  ;;  %v2465_v12 = vmul.f32 %v2461_v8, %v2443_v54 }
 0xaf9   : > { %v2474_v55 = vadd.f32 %v2470_v11, %v2448_v51  ;;  %v2469_v57 = vmul.f32 0.044715, %v2465_v12 }
 0xafb   : > { %v2478_v58 = vmul.f32 0.7978846, %v2474_v55  ;;  %v2473_v59 = vadd.f32 %v2469_v57, %v2443_v54 }
 0xafd   : > { %5626 = vtanh.f32 %v2478_v58  ;;  %v2477_v60 = vmul.f32 0.7978846, %v2473_v59 }
 0xafe   : > { %v5378_v61 = vpop.f32.mrf.mxu0 }
 0xaff   : > { %5628 = vtanh.f32 %v2477_v60  ;;  %v2458_v63 = vadd.f32 %v5378_v61, %v2363_v0 }
 0xb00   : > { %v2452_v1 = vpop.f32.mrf.mxu0 }
 0xb01   : > { %v2464_v4 = vmul.f32 %v2458_v63, %v2458_v63  ;;  %v2453_v5 = vadd.f32 %v2452_v1, %v2363_v0 }
 0xb03   : > { %v2468_v7 = vmul.f32 %v2464_v4, %v2458_v63  ;;  %v2463_v9 = vmul.f32 %v2453_v5, %v2453_v5 }
 0xb05   : > { %v2472_v10 = vmul.f32 0.044715, %v2468_v7  ;;  %v2467_v13 = vmul.f32 %v2463_v9, %v2453_v5 }
 0xb07   : > { %v2476_v14 = vadd.f32 %v2472_v10, %v2458_v63  ;;  %v2471_v16 = vmul.f32 0.044715, %v2467_v13 }
 0xb09   : > { %v2480_v17 = vmul.f32 0.7978846, %v2476_v14  ;;  %v2475_v19 = vadd.f32 %v2471_v16, %v2453_v5 }
 0xb0a   : > { %v5627_v25 = vpop.eup %5626 }
 0xb0b   : > { %v2486_v26 = vadd.f32 1.0, %v5627_v25  ;;  %5630 = vtanh.f32 %v2480_v17  ;;  %v2479_v27 = vmul.f32 0.7978846, %v2475_v19 }
 0xb0c   : > { %v5629_v29 = vpop.eup %5628 }
 0xb0d   : > { %5632 = vtanh.f32 %v2479_v27  ;;  %v2485_v30 = vadd.f32 1.0, %v5629_v29  ;;  %v2490_v31 = vmul.f32 0.5, %v2486_v26  ;;  %v5029_v27 = vld [vmem:[%s5808_s22 + $0x38] sm:$0xff]  ;;  %v5028_v29 = vld [vmem:[%s5808_s22 + $0x30] sm:$0xff] }
 0xb0e   : > { %5401 = vmatprep.subr.mxu0 %v5029_v27 }
 0xb0f   : > { %v2489_v32 = vmul.f32 0.5, %v2485_v30  ;;  %v2494_v36 = vmul.f32 %v2490_v31, %v2448_v51  ;;  %5402 = vmatpush3.msra.mxu0 %v5029_v27  ;;  %v5027_v30 = vld [vmem:[%s5808_s22 + $0x28] sm:$0xff]  ;;  %v5026_v31 = vld [vmem:[%s5808_s22 + $0x20] sm:$0xff] }
 0xb10   : > { %5403 = vmatprep.subr.mxu0 %v5028_v29 }
 0xb11   : > { %v2493_v18 = vmul.f32 %v2489_v32, %v2443_v54  ;;  %5404 = vmatpush3.msra.mxu0 %v5028_v29 }
 0xb12   : > { %5405 = vmatprep.subr.mxu0 %v5027_v30 }
 0xb13   : > { %5395 = vmatprep.mubr.msk.f32.mxu1 %vm2509_vm4, %v2493_v18  ;;  %5406 = vmatpush3.msra.mxu0 %v5027_v30 }
 0xb14   : > { %5396 = vmatmul.mubr.msk.f32.vlgmr.msra.gmra.mxu1 %vm2509_vm4, %v2494_v36  ;;  %5407 = vmatprep.subr.mxu0 %v5026_v31 }
 0xb15   : > { %5408 = vmatpush3.msra.mxu0 %v5026_v31 }
 0xb16   : > { %5415 = vmatprep.subr.mxu0 %v5708_v3 }
 0xb18   : > { %v5631_v20 = vpop.eup %5630 }
 0xb19   : > { %v2488_v37 = vadd.f32 1.0, %v5631_v20 }
 0xb1a   : > { %v5633_v62 = vpop.eup %5632 }
 0xb1b   : > { %v2487_v39 = vadd.f32 1.0, %v5633_v62  ;;  %v2492_v41 = vmul.f32 0.5, %v2488_v37 }
 0xb1d   : > { %v2491_v42 = vmul.f32 0.5, %v2487_v39  ;;  %v2496_v45 = vmul.f32 %v2492_v41, %v2458_v63  ;;  %v2665_v39 = vsub.s32 4, %v5815_v44 }
 0xb1f   : > { %v2495_v43 = vmul.f32 %v2491_v42, %v2453_v5 }
 0xb21   : > { %5398 = vmatprep.mubr.msk.f32.mxu1 %vm2509_vm4, %v2495_v43 }
 0xb22   : > { %5399 = vmatmul.mubr.msk.f32.gmra.mxu1 %vm2509_vm4, %v2496_v45 }
 0xb23   : > { %5422 = vmatprep.mubr.msk.f32.mxu1 %vm5709_vm1, %v5708_v3 }
 0xbd4   : > { %v5397_v22 = vpop.f32.mrf.mxu1 }
 0xbd5   : > { %v2594_v49 = vadd.f32 %v5397_v22, %v2508_v47 }
 0xbd6   : > { %v2588_v0 = vpop.f32.mrf.mxu1 }
 0xbd7   : > { %v2589_v2 = vadd.f32 %v2588_v0, %v2508_v47  ;;  %v2608_v51 = vadd.f32 %v2594_v49, %v6095_v35  ;;  %v2666_v49 = vrot.slane %v6057_v15, %v2665_v39  ;;  %v2673_v0 = vsub.s32 5, %v5815_v44 }
 0xbd9   : > { %v2614_v52 = vsel %vm531_vm0, %v2608_v51, 0.0  ;;  %v2607_v53 = vadd.f32 %v2589_v2, %v6093_v33 }
 0xbda   : > { %2615 = vadd.xlane.f32.xlu1 %v2614_v52 }
 0xbdb   : > { %v2611_v54 = vsel %vm531_vm0, %v2607_v53, 0.0 }
 0xbdc   : > { %2612 = vadd.xlane.f32.xlu0 %v2611_v54 }
 0xbe2   : > { %v5400_v6 = vpop.f32.mrf.mxu1 }
 0xbe3   : > { %v2604_v8 = vadd.f32 %v5400_v6, %v2508_v47  ;;  %v2674_v6 = vrot.slane %v6057_v15, %v2673_v0 }
 0xbe4   : > { %v2598_v11 = vpop.f32.mrf.mxu1 }
 0xbe5   : > { %v2599_v12 = vadd.f32 %v2598_v11, %v2508_v47  ;;  %v2610_v55 = vadd.f32 %v2604_v8, %v6105_v56 }
 0xbe7   : > { %v2620_v57 = vsel %vm531_vm0, %v2610_v55, 0.0  ;;  %v2609_v58 = vadd.f32 %v2599_v12, %v6101_v38 }
 0xbe8   : > { %2621 = vadd.xlane.f32.xlu1 %v2620_v57 }
 0xbe9   : > { %v2617_v35 = vsel %vm531_vm0, %v2609_v58, 0.0 }
 0xbea   : > { %2618 = vadd.xlane.f32.xlu0 %v2617_v35 }
 0xc63   : > { %v2616_v59 = vpop.xlane.xlu1 %2615 }
 0xc64   : > { %v2624_v33 = vmul.f32 0.03125, %v2616_v59 }
 0xc65   : > { %v2613_v60 = vpop.xlane.xlu0 %2612 }
 0xc66   : > { %v2628_v61 = vsub.f32 %v2608_v51, %v2624_v33  ;;  %v2623_v63 = vmul.f32 0.03125, %v2613_v60 }
 0xc68   : > { %v2627_v1 = vsub.f32 %v2607_v53, %v2623_v63  ;;  %v2632_v4 = vmul.f32 %v2628_v61, %v2628_v61 }
 0xc6a   : > { %v2638_v5 = vsel %vm531_vm0, %v2632_v4, 0.0  ;;  %v2631_v7 = vmul.f32 %v2627_v1, %v2627_v1 }
 0xc6b   : > { %2639 = vadd.xlane.f32.xlu1 %v2638_v5 }
 0xc6c   : > { %v2635_v56 = vsel %vm531_vm0, %v2631_v7, 0.0 }
 0xc6d   : > { %2636 = vadd.xlane.f32.xlu0 %v2635_v56 }
 0xc71   : > { %v2622_v38 = vpop.xlane.xlu1 %2621 }
 0xc72   : > { %v2626_v9 = vmul.f32 0.03125, %v2622_v38 }
 0xc73   : > { %v2619_v10 = vpop.xlane.xlu0 %2618 }
 0xc74   : > { %v2630_v13 = vsub.f32 %v2610_v55, %v2626_v9  ;;  %v2625_v14 = vmul.f32 0.03125, %v2619_v10 }
 0xc76   : > { %v2629_v16 = vsub.f32 %v2609_v58, %v2625_v14  ;;  %v2634_v17 = vmul.f32 %v2630_v13, %v2630_v13 }
 0xc78   : > { %v2644_v19 = vsel %vm531_vm0, %v2634_v17, 0.0  ;;  %v2633_v25 = vmul.f32 %v2629_v16, %v2629_v16 }
 0xc79   : > { %2645 = vadd.xlane.f32.xlu1 %v2644_v19 }
 0xc7a   : > { %v2641_v26 = vsel %vm531_vm0, %v2633_v25, 0.0 }
 0xc7b   : > { %2642 = vadd.xlane.f32.xlu0 %v2641_v26 }
 0xcf4   : > { %v2640_v32 = vpop.xlane.xlu1 %2639 }
 0xcf5   : > { %v2648_v18 = vmul.f32 0.03125, %v2640_v32 }
 0xcf6   : > { %v2637_v36 = vpop.xlane.xlu0 %2636 }
 0xcf7   : > { %v2652_v20 = vadd.f32 1e-12, %v2648_v18  ;;  %v2647_v37 = vmul.f32 0.03125, %v2637_v36 }
 0xcf9   : > { %5634 = vrsqrt.f32 %v2652_v20  ;;  %v2651_v62 = vadd.f32 1e-12, %v2647_v37 }
 0xcfb   : > { %5636 = vrsqrt.f32 %v2651_v62 }
 0xd02   : > { %v2646_v41 = vpop.xlane.xlu1 %2645 }
 0xd03   : > { %v2650_v42 = vmul.f32 0.03125, %v2646_v41 }
 0xd04   : > { %v2643_v43 = vpop.xlane.xlu0 %2642 }
 0xd05   : > { %v2654_v45 = vadd.f32 1e-12, %v2650_v42  ;;  %v2649_v47 = vmul.f32 0.03125, %v2643_v43 }
 0xd06   : > { %v5635_v22 = vpop.eup %5634 }
 0xd07   : > { %v2660_v2 = vmul.f32 %v5635_v22, %v2628_v61  ;;  %5638 = vrsqrt.f32 %v2654_v45  ;;  %v2653_v51 = vadd.f32 1e-12, %v2649_v47  ;;  %v5036_v61 = vld [vmem:[%s5859_s29 + $0x1] ss:$0 sm:$0xff]  ;;  %s488_s29 = scalar_lea.vmem %s6446_s2, %s5903_s11 }
 0xd08   : > { %v5637_v52 = vpop.eup %5636 }
 0xd09   : > { %5640 = vrsqrt.f32 %v2653_v51  ;;  %v2659_v53 = vmul.f32 %v5637_v52, %v2627_v1  ;;  %v2668_v54 = vmul.f32 %v2666_v49, %v2660_v2 }
 0xd0b   : > { %v2667_v8 = vmul.f32 %v2666_v49, %v2659_v53  ;;  %v6165_v12 = vadd.f32 %v2674_v6, %v2668_v54 }
 0xd0d   : > { %v6163_v11 = vadd.f32 %v2674_v6, %v2667_v8 }
 0xd0f   : > { %5409 = vmatprep.mubr.msk.f32.mxu0 %vm531_vm0, %v6163_v11 }
 0xd10   : > { %5410 = vmatmul.mubr.msk.f32.vlgmr.msra.gmra.mxu0 %vm531_vm0, %v6165_v12 }
 0xd14   : > { %v5639_v55 = vpop.eup %5638 }
 0xd15   : > { %v2662_v57 = vmul.f32 %v5639_v55, %v2630_v13 }
 0xd16   : > { %v5641_v58 = vpop.eup %5640 }
 0xd17   : > { %v2661_v35 = vmul.f32 %v5641_v58, %v2629_v16  ;;  %v2670_v59 = vmul.f32 %v2666_v49, %v2662_v57 }
 0xd19   : > { %v2669_v33 = vmul.f32 %v2666_v49, %v2661_v35  ;;  %v6173_v15 = vadd.f32 %v2674_v6, %v2670_v59 }
 0xd1b   : > { %v6171_v60 = vadd.f32 %v2674_v6, %v2669_v33 }
 0xd1d   : > { %5412 = vmatprep.mubr.msk.f32.mxu0 %vm531_vm0, %v6171_v60 }
 0xd1e   : > { %5413 = vmatmul.mubr.msk.f32.gmra.mxu0 %vm531_vm0, %v6173_v15 }
 0xd1f   : > { %5417 = vmatprep.mubr.msk.f32.mxu0 %vm5709_vm1, %v5708_v3 }
 0xdd0   : > { %v5411_v63 = vpop.f32.mrf.mxu0 }
 0xdd1   : > { %v6182_v1 = vadd.f32 %v5411_v63, %v5036_v61 }
 0xdd2   : > { %v2777_v4 = vpop.f32.mrf.mxu0 }
 0xdd3   : > { %v6184_v5 = vadd.f32 %v5036_v61, %v2777_v4  ;;  %2874 = vrot.lane.b32.xlu1 %v6182_v1, %s5710_s30 }
 0xdd5   : > { %2797 = vrot.lane.b32.xlu0 %v6184_v5, %s5710_s30 }
 0xdde   : > { %v5414_v7 = vpop.f32.mrf.mxu0 }
 0xddf   : > { %v6194_v9 = vadd.f32 %v5414_v7, %v5036_v61 }
 0xde0   : > { %v2787_v56 = vpop.f32.mrf.mxu0 }
 0xde1   : > { %v6190_v38 = vadd.f32 %v5036_v61, %v2787_v56 }
 0xde3   : > { %2951 = vrot.lane.b32.xlu1 %v6190_v38, %s5710_s30 }
 0xde7   : > { %3028 = vrot.lane.b32.xlu1 %v6194_v9, %s5710_s30 }
 0xe45   : > { %v2875_v10 = vpop.permute.xlu1 %2874 }
 0xe46   : > { %5421 = vmatpush3.xpose.msk.msra.mxu1 %vm763_vm2, %v2875_v10 }
 0xe47   : > { %v2798_v13 = vpop.permute.xlu0 %2797  ;;  %5430 = vmatprep.subr.mxu1 %v5708_v3 }
 0xe48   : > { %5416 = vmatpush3.xpose.msk.msra.mxu0 %vm763_vm2, %v2798_v13 }
 0xe49   : > { %5423 = vmatmul.mubr.msk.f32.vlgmr.msra.gmra.mxu1 %vm763_vm2, %v6182_v1  ;;  %5425 = vmatprep.subr.mxu0 %v5708_v3 }
 0xe4a   : > { %5432 = vmatprep.mubr.msk.f32.mxu1 %vm5709_vm1, %v5708_v3 }
 0xe4b   : > { %5418 = vmatmul.mubr.msk.f32.vlgmr.msra.gmra.mxu0 %vm763_vm2, %v6184_v5 }
 0xe4c   : > { %5427 = vmatprep.mubr.msk.f32.mxu0 %vm5709_vm1, %v5708_v3 }
 0xe55   : > { %v2952_v14 = vpop.permute.xlu1 %2951 }
 0xe56   : > { %5426 = vmatpush3.xpose.msk.msra.mxu0 %vm763_vm2, %v2952_v14 }
 0xe57   : > { %5435 = vmatprep.subr.mxu0 %v5708_v3 }
 0xe59   : > { %v3029_v16 = vpop.permute.xlu1 %3028  ;;  %5428 = vmatmul.mubr.msk.f32.vlgmr.msra.gmra.mxu0 %vm763_vm2, %v6190_v38 }
 0xe5a   : > { %5431 = vmatpush3.xpose.msk.msra.mxu1 %vm763_vm2, %v3029_v16  ;;  %5437 = vmatprep.mubr.msk.f32.mxu0 %vm5709_vm1, %v5708_v3 }
 0xe5b   : > { %5440 = vmatprep.subr.mxu1 %v5708_v3 }
 0xe5d   : > { %5433 = vmatmul.mubr.msk.f32.vlgmr.msra.gmra.mxu1 %vm763_vm2, %v6194_v9 }
 0xe5e   : > { %5442 = vmatprep.mubr.msk.f32.mxu1 %vm5709_vm1, %v5708_v3 }
 0xf09   : > { %v2946_v17 = vpop.f32.mrf.mxu1 }
 0xf0a   : > { %v2947_v19 = vadd.f32 %v2946_v17, %v5915_v28 }
 0xf0b   : > { %v2869_v25 = vpop.f32.mrf.mxu0  ;;  %v5424_v26 = vpop.f32.mrf.mxu1 }
 0xf0c   : > { %v2870_v27 = vadd.f32 %v2869_v25, %v5911_v24  ;;  %v3107_v29 = vsel %vm1069_vm3, %v2947_v19, -inf }
 0xf0d   : > { %3108 = vmax.xlane.f32.xlu1 %v3107_v29  ;;  %v5419_v30 = vpop.f32.mrf.mxu0 }
 0xf0e   : > { %v3104_v31 = vsel %vm1069_vm3, %v2870_v27, -inf }
 0xf0f   : > { %3105 = vmax.xlane.f32.xlu0 %v3104_v31 }
 0xf19   : > { %v3023_v32 = vpop.f32.mrf.mxu0 }
 0xf1a   : > { %v3024_v18 = vadd.f32 %v3023_v32, %v5920_v34 }
 0xf1b   : > { %v5429_v36 = vpop.f32.mrf.mxu0 }
 0xf1c   : > { %v3110_v20 = vsel %vm1069_vm3, %v3024_v18, -inf }
 0xf1d   : > { %v3100_v37 = vpop.f32.mrf.mxu1  ;;  %3111 = vmax.xlane.f32.xlu0 %v3110_v20 }
 0xf1e   : > { %v3101_v62 = vadd.f32 %v3100_v37, %v5925_v40 }
 0xf1f   : > { %v5434_v41 = vpop.f32.mrf.mxu1 }
 0xf20   : > { %v3113_v42 = vsel %vm1069_vm3, %v3101_v62, -inf }
 0xf21   : > { %3114 = vmax.xlane.f32.xlu0 %v3113_v42  ;;  %v5032_v42 = vld [vmem:[%s5977_s24 + $0x28] sm:$0xff] }
 0xf96   : > { %v3109_v43 = vpop.xlane.xlu1 %3108 }
 0xf97   : > { %v3117_v45 = vsub.f32 %v2947_v19, %v3109_v43  ;;  %v5031_v43 = vld [vmem:[%s5977_s24 + $0x20] sm:$0xff] }
 0xf98   : > { %v3106_v47 = vpop.xlane.xlu0 %3105 }
 0xf99   : > { %v3122_v22 = vmul.f32 1.442695, %v3117_v45  ;;  %v3116_v49 = vsub.f32 %v2870_v27, %v3106_v47 }
 0xf9b   : > { %5642 = vpow2.f32 %v3122_v22  ;;  %v3120_v2 = vmul.f32 1.442695, %v3116_v49 }
 0xf9d   : > { %5644 = vpow2.f32 %v3120_v2 }
 0xfa6   : > { %v3112_v51 = vpop.xlane.xlu0 %3111 }
 0xfa7   : > { %v3118_v52 = vsub.f32 %v3024_v18, %v3112_v51 }
 0xfa8   : > { %v5643_v53 = vpop.eup %5642 }
 0xfa9   : > { %v3124_v54 = vmul.f32 1.442695, %v3118_v52  ;;  %v3131_v6 = vsel %vm1069_vm3, %v5643_v53, 0.0 }
 0xfaa   : > { %v5645_v8 = vpop.eup %5644  ;;  %3132 = vadd.xlane.f32.xlu1 %v3131_v6  ;;  %v3115_v55 = vpop.xlane.xlu0 %3114 }
 0xfab   : > { %5646 = vpow2.f32 %v3124_v54  ;;  %v3119_v57 = vsub.f32 %v3101_v62, %v3115_v55  ;;  %v3128_v58 = vsel %vm1069_vm3, %v5645_v8, 0.0 }
 0xfac   : > { %3129 = vadd.xlane.f32.xlu0 %v3128_v58 }
 0xfad   : > { %v3126_v35 = vmul.f32 1.442695, %v3119_v57 }
 0xfaf   : > { %5648 = vpow2.f32 %v3126_v35 }
 0xfb8   : > { %v5647_v59 = vpop.eup %5646 }
 0xfb9   : > { %v3134_v33 = vsel %vm1069_vm3, %v5647_v59, 0.0 }
 0xfba   : > { %3135 = vadd.xlane.f32.xlu0 %v3134_v33 }
 0xfbc   : > { %v5649_v61 = vpop.eup %5648 }
 0xfbd   : > { %v3137_v63 = vsel %vm1069_vm3, %v5649_v61, 0.0 }
 0xfbe   : > { %3138 = vadd.xlane.f32.xlu1 %v3137_v63 }
 0xfcf   : > { %3224 = vrot.lane.b32.xlu1 %v6182_v1, %s5712_s17 }
 0xfd0   : > { %3148 = vrot.lane.b32.xlu0 %v6184_v5, %s5712_s17 }
 0xfd3   : > { %3300 = vrot.lane.b32.xlu1 %v6190_v38, %s5712_s17 }
 0xfd4   : > { %3559 = vrot.lane.b32.xlu0 %v6184_v5, %s5713_s18 }
 0xfd7   : > { %3376 = vrot.lane.b32.xlu1 %v6194_v9, %s5712_s17 }
 0xfd8   : > { %3637 = vrot.lane.b32.xlu0 %v6182_v1, %s5713_s18 }
 0xfdb   : > { %3557 = vrot.lane.b32.xlu1 %v6184_v5, %s5714_s20 }
 0xfdc   : > { %3715 = vrot.lane.b32.xlu0 %v6190_v38, %s5713_s18 }
 0xfdf   : > { %3635 = vrot.lane.b32.xlu1 %v6182_v1, %s5714_s20 }
 0xfe0   : > { %3713 = vrot.lane.b32.xlu0 %v6190_v38, %s5714_s20 }
 0xfe3   : > { %3793 = vrot.lane.b32.xlu1 %v6194_v9, %s5713_s18  ;;  %s525_s18 = scalar_lea.vmem %s6454_s10, %s5903_s11 }
 0xfe7   : > { %3791 = vrot.lane.b32.xlu1 %v6194_v9, %s5714_s20 }
0x1033   : > { %v3133_v7 = vpop.xlane.xlu1 %3132 }
0x1035   : > { %v3130_v4 = vpop.xlane.xlu0 %3129 }
0x1036   : > { %5650 = vrcp.f32 %v3130_v4 }
0x1037   : > { %5652 = vrcp.f32 %v3133_v7 }
0x1043   : > { %v3136_v56 = vpop.xlane.xlu0 %3135  ;;  %v5651_v10 = vpop.eup %5650 }
0x1044   : > { %5654 = vrcp.f32 %v3136_v56  ;;  %v3144_v16 = vmul.f32 %v5651_v10, %v5645_v8  ;;  %v5653_v17 = vpop.eup %5652 }
0x1045   : > { %v3145_v25 = vmul.f32 %v5653_v17, %v5643_v53 }
0x1047   : > { %v3139_v13 = vpop.xlane.xlu1 %3138  ;;  %v3149_v14 = vpop.permute.xlu0 %3148 }
0x1048   : > { %5656 = vrcp.f32 %v3139_v13  ;;  %5436 = vmatpush3.msra.mxu0 %v3149_v14 }
0x1049   : > { %5438 = vmatmul.mubr.msk.f32.vlgmr.msra.gmra.mxu0 %vm1069_vm3, %v3144_v16  ;;  %5445 = vmatprep.subr.mxu0 %v5708_v3 }
0x104a   : > { %5447 = vmatprep.mubr.msk.f32.mxu0 %vm5709_vm1, %v5708_v3 }
0x104b   : > { %v3225_v19 = vpop.permute.xlu1 %3224  ;;  %v3560_v32 = vpop.permute.xlu0 %3559 }
0x104c   : > { %5441 = vmatpush3.msra.mxu1 %v3225_v19 }
0x104d   : > { %5443 = vmatmul.mubr.msk.f32.vlgmr.msra.gmra.mxu1 %vm1069_vm3, %v3145_v25  ;;  %5450 = vmatprep.subr.mxu1 %v5708_v3 }
0x104e   : > { %5452 = vmatprep.mubr.msk.f32.mxu1 %vm5709_vm1, %v5708_v3 }
0x104f   : > { %v3301_v26 = vpop.permute.xlu1 %3300  ;;  %v3638_v37 = vpop.permute.xlu0 %3637 }
0x1050   : > { %5446 = vmatpush3.msra.mxu0 %v3301_v26 }
0x1051   : > { %v5655_v27 = vpop.eup %5654  ;;  %5455 = vmatprep.subr.mxu0 %v5032_v42 }
0x1052   : > { %v3146_v29 = vmul.f32 %v5655_v27, %v5647_v59 }
0x1053   : > { %v3377_v30 = vpop.permute.xlu1 %3376  ;;  %v3716_v49 = vpop.permute.xlu0 %3715 }
0x1054   : > { %5448 = vmatmul.mubr.msk.f32.vlgmr.msra.gmra.mxu0 %vm1069_vm3, %v3146_v29  ;;  %5451 = vmatpush3.msra.mxu1 %v3377_v30 }
0x1055   : > { %v5657_v31 = vpop.eup %5656  ;;  %5465 = vmatprep.subr.mxu1 %v5708_v3  ;;  %5456 = vmatpush3.msra.mxu0 %v5032_v42 }
0x1056   : > { %v3147_v18 = vmul.f32 %v5657_v31, %v5649_v61  ;;  %5457 = vmatprep.subr.mxu0 %v5031_v43 }
0x1057   : > { %v3558_v36 = vpop.permute.xlu1 %3557  ;;  %5458 = vmatpush3.msra.mxu0 %v5031_v43  ;;  %v3714_v6 = vpop.permute.xlu0 %3713 }
0x1058   : > { %5453 = vmatmul.mubr.msk.f32.vlgmr.msra.gmra.mxu1 %vm1069_vm3, %v3147_v18  ;;  %5475 = vmatprep.subr.mxu0 %v5708_v3 }
0x1059   : > { %5466 = vmatpush3.xpose.msk.msra.mxu1 %vm763_vm2, %v3560_v32  ;;  %5467 = vmatprep.mubr.msk.f32.mxu1 %vm5709_vm1, %v5708_v3 }
0x105a   : > { %5470 = vmatprep.subr.mxu1 %v5708_v3 }
0x105b   : > { %v3636_v20 = vpop.permute.xlu1 %3635 }
0x105c   : > { %5468 = vmatmul.mubr.msk.f32.vlgmr.msra.gmra.mxu1 %vm763_vm2, %v3558_v36 }
0x105d   : > { %5471 = vmatpush3.xpose.msk.msra.mxu1 %vm763_vm2, %v3638_v37  ;;  %5472 = vmatprep.mubr.msk.f32.mxu1 %vm5709_vm1, %v5708_v3 }
0x105e   : > { %5480 = vmatprep.subr.mxu1 %v5708_v3 }
0x105f   : > { %v3794_v62 = vpop.permute.xlu1 %3793 }
0x1060   : > { %5473 = vmatmul.mubr.msk.f32.vlgmr.msra.gmra.mxu1 %vm763_vm2, %v3636_v20 }
0x1061   : > { %5481 = vmatpush3.xpose.msk.msra.mxu1 %vm763_vm2, %v3794_v62  ;;  %5482 = vmatprep.mubr.msk.f32.mxu1 %vm5709_vm1, %v5708_v3 }
0x1062   : > { %5490 = vmatprep.subr.mxu1 %v5708_v3 }
0x1063   : > { %v3792_v41 = vpop.permute.xlu1 %3791 }
0x1064   : > { %5483 = vmatmul.mubr.msk.f32.vlgmr.msra.gmra.mxu1 %vm763_vm2, %v3792_v41 }
0x1065   : > { %5492 = vmatprep.mubr.msk.f32.mxu1 %vm5709_vm1, %v5708_v3 }
0x1109   : > { %v3220_v45 = vpop.f32.mrf.mxu0 }
0x110a   : > { %5459 = vmatprep.mubr.msk.f32.mxu0 %vm763_vm2, %v3220_v45 }
0x110b   : > { %v5439_v47 = vpop.f32.mrf.mxu0 }
0x110d   : > { %v3296_v22 = vpop.f32.mrf.mxu1 }
0x110e   : > { %5460 = vmatmul.mubr.msk.f32.vlgmr.msra.gmra.mxu0 %vm763_vm2, %v3296_v22 }
0x110f   : > { %5476 = vmatpush3.xpose.msk.msra.mxu0 %vm763_vm2, %v3716_v49  ;;  %v5444_v2 = vpop.f32.mrf.mxu1 }
0x1110   : > { %5485 = vmatprep.subr.mxu0 %v5708_v3 }
0x1114   : > { %v3372_v51 = vpop.f32.mrf.mxu0 }
0x1115   : > { %5462 = vmatprep.mubr.msk.f32.mxu0 %vm763_vm2, %v3372_v51 }
0x1116   : > { %v5449_v52 = vpop.f32.mrf.mxu0 }
0x1118   : > { %v3448_v53 = vpop.f32.mrf.mxu1 }
0x1119   : > { %5463 = vmatmul.mubr.msk.f32.gmra.mxu0 %vm763_vm2, %v3448_v53 }
0x111a   : > { %v5454_v54 = vpop.f32.mrf.mxu1  ;;  %5477 = vmatprep.mubr.msk.f32.mxu0 %vm5709_vm1, %v5708_v3 }
0x111c   : > { %v3631_v8 = vpop.f32.mrf.mxu1 }
0x111d   : > { %v3632_v55 = vadd.f32 %v3631_v8, %v5911_v24  ;;  %5478 = vmatmul.mubr.msk.f32.vlgmr.msra.gmra.mxu0 %vm763_vm2, %v3714_v6 }
0x111e   : > { %v5469_v57 = vpop.f32.mrf.mxu1  ;;  %5487 = vmatprep.mubr.msk.f32.mxu0 %vm5709_vm1, %v5708_v3 }
0x111f   : > { %v3869_v58 = vsel %vm1069_vm3, %v3632_v55, -inf }
0x1120   : > { %3870 = vmax.xlane.f32.xlu0 %v3869_v58  ;;  %v3709_v35 = vpop.f32.mrf.mxu1 }
0x1121   : > { %v3710_v59 = vadd.f32 %v3709_v35, %v5915_v28 }
0x1122   : > { %v5474_v33 = vpop.f32.mrf.mxu1 }
0x1123   : > { %v3872_v61 = vsel %vm1069_vm3, %v3710_v59, -inf  ;;  %v5033_v33 = vld [vmem:[%s5977_s24 + $0x30] sm:$0xff] }
0x1124   : > { %3873 = vmax.xlane.f32.xlu1 %v3872_v61  ;;  %v3865_v63 = vpop.f32.mrf.mxu1 }
0x1125   : > { %v3866_v31 = vadd.f32 %v3865_v63, %v5925_v40 }
0x1126   : > { %v5484_v4 = vpop.f32.mrf.mxu1 }
0x1127   : > { %v3878_v18 = vsel %vm1069_vm3, %v3866_v31, -inf }
0x11a9   : > { %v3871_v14 = vpop.xlane.xlu0 %3870 }
0x11aa   : > { %v3881_v16 = vsub.f32 %v3632_v55, %v3871_v14  ;;  %v6345_v14 = vld [vmem:[%s6054_s12 + $0x8] sm:$0xff] }
0x11ac   : > { %v3885_v19 = vmul.f32 1.442695, %v3881_v16  ;;  %v3552_v16 = vrot.slane %v6345_v14, %v5823_v46 }
0x11ad   : > { %v3874_v7 = vpop.xlane.xlu1 %3873 }
0x11ae   : > { %v3882_v24 = vsub.f32 %v3710_v59, %v3874_v7  ;;  %v5034_v59 = vld [vmem:[%s5977_s24 + $0x38] sm:$0xff] }
0x11b0   : > { %v3887_v56 = vmul.f32 1.442695, %v3882_v24 }
0x11b2   : > { %5658 = vpow2.f32 %v3887_v56 }
0x11b3   : > { %5660 = vpow2.f32 %v3885_v19 }
0x11bf   : > { %v5659_v10 = vpop.eup %5658 }
0x11c0   : > { %v3896_v13 = vsel %vm1069_vm3, %v5659_v10, 0.0  ;;  %v5661_v36 = vpop.eup %5660 }
0x11c1   : > { %3897 = vadd.xlane.f32.xlu1 %v3896_v13  ;;  %v3893_v20 = vsel %vm1069_vm3, %v5661_v36, 0.0 }
0x11ce   : > { %v6305_v17 = vpop.f32.mrf.mxu0 }
0x11cf   : > { %v3554_v19 = vadd.f32 %v6305_v17, %v3552_v16 }
0x11d0   : > { %v6307_v28 = vpop.f32.mrf.mxu0 }
0x11d9   : > { %v6309_v25 = vpop.f32.mrf.mxu0 }
0x11da   : > { %v3556_v46 = vadd.f32 %v6309_v25, %v3552_v16 }
0x11db   : > { %v6311_v26 = vpop.f32.mrf.mxu0 }
0x11dc   : > { %v3555_v17 = vadd.f32 %v3552_v16, %v6311_v26 }
0x11dd   : > { %v3787_v27 = vpop.f32.mrf.mxu0 }
0x11de   : > { %v3788_v29 = vadd.f32 %v3787_v27, %v5920_v34 }
0x11df   : > { %v5479_v30 = vpop.f32.mrf.mxu0 }
0x11e0   : > { %v3875_v32 = vsel %vm1069_vm3, %v3788_v29, -inf }
0x11e1   : > { %3876 = vmax.xlane.f32.xlu0 %v3875_v32 }
0x11e5   : > { %3879 = vmax.xlane.f32.xlu0 %v3878_v18 }
0x11e9   : > { %3894 = vadd.xlane.f32.xlu0 %v3893_v20 }
0x124a   : > { %v3898_v2 = vpop.xlane.xlu1 %3897 }
0x126a   : > { %v3877_v37 = vpop.xlane.xlu0 %3876 }
0x126b   : > { %v3883_v62 = vsub.f32 %v3788_v29, %v3877_v37  ;;  %v3553_v29 = vadd.f32 %v3552_v16, %v6307_v28 }
0x126d   : > { %v3889_v41 = vmul.f32 1.442695, %v3883_v62 }
0x126e   : > { %v3880_v42 = vpop.xlane.xlu0 %3879 }
0x126f   : > { %5662 = vpow2.f32 %v3889_v41  ;;  %v3884_v43 = vsub.f32 %v3866_v31, %v3880_v42 }
0x1271   : > { %v3891_v34 = vmul.f32 1.442695, %v3884_v43 }
0x1272   : > { %v3895_v49 = vpop.xlane.xlu0 %3894 }
0x1273   : > { %5664 = vpow2.f32 %v3891_v34 }
0x1274   : > { %5666 = vrcp.f32 %v3895_v49 }
0x1275   : > { %5668 = vrcp.f32 %v3898_v2 }
0x127c   : > { %v5663_v45 = vpop.eup %5662 }
0x127d   : > { %v3899_v40 = vsel %vm1069_vm3, %v5663_v45, 0.0 }
0x127e   : > { %3900 = vadd.xlane.f32.xlu0 %v3899_v40 }
0x1280   : > { %v5665_v47 = vpop.eup %5664 }
0x1281   : > { %v3902_v22 = vsel %vm1069_vm3, %v5665_v47, 0.0  ;;  %v5667_v52 = vpop.eup %5666 }
0x1282   : > { %3903 = vadd.xlane.f32.xlu1 %v3902_v22  ;;  %v3909_v6 = vmul.f32 %v5667_v52, %v5661_v36 }
0x1293   : > { %3989 = vrot.lane.b32.xlu1 %v6182_v1, %s5715_s25  ;;  %v5669_v1 = vpop.eup %5668 }
0x1294   : > { %3913 = vrot.lane.b32.xlu0 %v6184_v5, %s5715_s25 }
0x1297   : > { %4065 = vrot.lane.b32.xlu1 %v6190_v38, %s5715_s25  ;;  %v3910_v38 = vmul.f32 %v5669_v1, %v5659_v10 }
0x129b   : > { %4141 = vrot.lane.b32.xlu1 %v6194_v9, %s5715_s25 }
0x1307   : > { %v3901_v51 = vpop.xlane.xlu0 %3900 }
0x1308   : > { %5670 = vrcp.f32 %v3901_v51 }
0x130b   : > { %v3904_v53 = vpop.xlane.xlu1 %3903  ;;  %v3914_v54 = vpop.permute.xlu0 %3913 }
0x130c   : > { %5672 = vrcp.f32 %v3904_v53  ;;  %5486 = vmatpush3.msra.mxu0 %v3914_v54 }
0x130d   : > { %5488 = vmatmul.mubr.msk.f32.vlgmr.msra.gmra.mxu0 %vm1069_vm3, %v3909_v6  ;;  %5495 = vmatprep.subr.mxu0 %v5708_v3 }
0x130e   : > { %5497 = vmatprep.mubr.msk.f32.mxu0 %vm5709_vm1, %v5708_v3 }
0x130f   : > { %v3990_v5 = vpop.permute.xlu1 %3989 }
0x1310   : > { %5491 = vmatpush3.msra.mxu1 %v3990_v5 }
0x1311   : > { %5493 = vmatmul.mubr.msk.f32.vlgmr.msra.gmra.mxu1 %vm1069_vm3, %v3910_v38  ;;  %5500 = vmatprep.subr.mxu1 %v5708_v3 }
0x1312   : > { %5502 = vmatprep.mubr.msk.f32.mxu1 %vm5709_vm1, %v5708_v3 }
0x1313   : > { %v4066_v9 = vpop.permute.xlu1 %4065 }
0x1314   : > { %5496 = vmatpush3.msra.mxu0 %v4066_v9 }
0x1315   : > { %v5671_v8 = vpop.eup %5670  ;;  %5505 = vmatprep.subr.mxu0 %v5034_v59 }
0x1316   : > { %v3911_v55 = vmul.f32 %v5671_v8, %v5663_v45 }
0x1317   : > { %v4142_v57 = vpop.permute.xlu1 %4141 }
0x1318   : > { %5498 = vmatmul.mubr.msk.f32.vlgmr.msra.gmra.mxu0 %vm1069_vm3, %v3911_v55  ;;  %5501 = vmatpush3.msra.mxu1 %v4142_v57  ;;  %v5076_v55 = vld [vmem:[%s6081_s21 + $0x38] sm:$0xff]  ;;  %v5075_v57 = vld [vmem:[%s6081_s21 + $0x30] sm:$0xff] }
0x1319   : > { %v5673_v58 = vpop.eup %5672  ;;  %5506 = vmatpush3.msra.mxu0 %v5034_v59  ;;  %5515 = vmatprep.subr.mxu1 %v5076_v55 }
0x131a   : > { %v3912_v35 = vmul.f32 %v5673_v58, %v5665_v47  ;;  %5507 = vmatprep.subr.mxu0 %v5033_v33  ;;  %v5074_v58 = vld [vmem:[%s6081_s21 + $0x28] sm:$0xff] }
0x131b   : > { %5508 = vmatpush3.msra.mxu0 %v5033_v33 }
0x131c   : > { %5503 = vmatmul.mubr.msk.f32.vlgmr.msra.gmra.mxu1 %vm1069_vm3, %v3912_v35  ;;  %v5073_v35 = vld [vmem:[%s6081_s21 + $0x20] sm:$0xff] }
0x131d   : > { %5516 = vmatpush3.msra.mxu1 %v5076_v55 }
0x131e   : > { %5517 = vmatprep.subr.mxu1 %v5075_v57 }
0x131f   : > { %5518 = vmatpush3.msra.mxu1 %v5075_v57 }
0x1320   : > { %5519 = vmatprep.subr.mxu1 %v5074_v58 }
0x1321   : > { %5520 = vmatpush3.msra.mxu1 %v5074_v58 }
0x1322   : > { %5521 = vmatprep.subr.mxu1 %v5073_v35 }
0x1323   : > { %5522 = vmatpush3.msra.mxu1 %v5073_v35 }
0x1324   : > { %5551 = vmatprep.subr.mxu1 %v5708_v3 }
0x13cd   : > { %v3985_v61 = vpop.f32.mrf.mxu0 }
0x13ce   : > { %5509 = vmatprep.mubr.msk.f32.mxu0 %vm763_vm2, %v3985_v61 }
0x13cf   : > { %v5489_v63 = vpop.f32.mrf.mxu0 }
0x13d1   : > { %v4061_v4 = vpop.f32.mrf.mxu1 }
0x13d2   : > { %5510 = vmatmul.mubr.msk.f32.vlgmr.msra.gmra.mxu0 %vm763_vm2, %v4061_v4 }
0x13d3   : > { %v5494_v7 = vpop.f32.mrf.mxu1 }
0x13d8   : > { %v4137_v24 = vpop.f32.mrf.mxu0 }
0x13d9   : > { %5512 = vmatprep.mubr.msk.f32.mxu0 %vm763_vm2, %v4137_v24 }
0x13da   : > { %v5499_v56 = vpop.f32.mrf.mxu0 }
0x13dc   : > { %v4213_v10 = vpop.f32.mrf.mxu1 }
0x13dd   : > { %5513 = vmatmul.mubr.msk.f32.gmra.mxu0 %vm763_vm2, %v4213_v10 }
0x13de   : > { %v5504_v13 = vpop.f32.mrf.mxu1 }
0x1492   : > { %v5511_v27 = vpop.f32.mrf.mxu0 }
0x1493   : > { %v4315_v30 = vadd.f32 %v5511_v27, %v3554_v19  ;;  %v4377_v27 = vrot.slane %v6345_v14, %v5826_v48 }
0x1494   : > { %v4295_v31 = vpop.f32.mrf.mxu0 }
0x1495   : > { %v4319_v32 = vadd.f32 %v4315_v30, %v6165_v12  ;;  %v4314_v18 = vadd.f32 %v4295_v31, %v3553_v29 }
0x1497   : > { %v4325_v36 = vsel %vm531_vm0, %v4319_v32, 0.0  ;;  %v4318_v20 = vadd.f32 %v4314_v18, %v6163_v11  ;;  %v4385_v18 = vrot.slane %v6345_v14, %v2350_v23 }
0x1498   : > { %4326 = vadd.xlane.f32.xlu1 %v4325_v36 }
0x1499   : > { %v4322_v37 = vsel %vm531_vm0, %v4318_v20, 0.0 }
0x149a   : > { %4323 = vadd.xlane.f32.xlu0 %v4322_v37 }
0x149d   : > { %v5514_v62 = vpop.f32.mrf.mxu0 }
0x149e   : > { %v4317_v28 = vadd.f32 %v5514_v62, %v3556_v46 }
0x149f   : > { %v4305_v41 = vpop.f32.mrf.mxu0 }
0x14a0   : > { %v4316_v42 = vadd.f32 %v4305_v41, %v3555_v17  ;;  %v4321_v12 = vadd.f32 %v4317_v28, %v6173_v15 }
0x14a2   : > { %v4320_v43 = vadd.f32 %v4316_v42, %v6171_v60  ;;  %v4331_v11 = vsel %vm531_vm0, %v4321_v12, 0.0 }
0x14a4   : > { %v4328_v34 = vsel %vm531_vm0, %v4320_v43, 0.0 }
0x14a5   : > { %4329 = vadd.xlane.f32.xlu0 %v4328_v34  ;;  %v5087_v34 = vld [vmem:[%s6113_s27 + $0x70] sm:$0xff] }
0x14a9   : > { %4332 = vadd.xlane.f32.xlu0 %v4331_v11  ;;  %v5086_v11 = vld [vmem:[%s6113_s27 + $0x68] sm:$0xff] }
0x1521   : > { %v4327_v45 = vpop.xlane.xlu1 %4326 }
0x1522   : > { %v4335_v40 = vmul.f32 0.03125, %v4327_v45  ;;  %v5085_v45 = vld [vmem:[%s6113_s27 + $0x60] sm:$0xff] }
0x1523   : > { %v4324_v47 = vpop.xlane.xlu0 %4323 }
0x1524   : > { %v4339_v22 = vsub.f32 %v4319_v32, %v4335_v40  ;;  %v4334_v25 = vmul.f32 0.03125, %v4324_v47  ;;  %v5084_v40 = vld [vmem:[%s6113_s27 + $0x58] sm:$0xff]  ;;  %v5083_v47 = vld [vmem:[%s6113_s27 + $0x50] sm:$0xff] }
0x1526   : > { %v4338_v49 = vsub.f32 %v4318_v20, %v4334_v25  ;;  %v4343_v26 = vmul.f32 %v4339_v22, %v4339_v22  ;;  %v5081_v25 = vld [vmem:[%s6113_s27 + $0x40] sm:$0xff] }
0x1528   : > { %v4349_v2 = vsel %vm531_vm0, %v4343_v26, 0.0  ;;  %v4342_v51 = vmul.f32 %v4338_v49, %v4338_v49 }
0x1529   : > { %4350 = vadd.xlane.f32.xlu1 %v4349_v2 }
0x152a   : > { %v4346_v60 = vsel %vm531_vm0, %v4342_v51, 0.0 }
0x152b   : > { %4347 = vadd.xlane.f32.xlu0 %v4346_v60 }
0x152e   : > { %v4330_v15 = vpop.xlane.xlu0 %4329 }
0x152f   : > { %v4336_v52 = vmul.f32 0.03125, %v4330_v15 }
0x1531   : > { %v4340_v53 = vsub.f32 %v4320_v43, %v4336_v52 }
0x1532   : > { %v4333_v54 = vpop.xlane.xlu0 %4332 }
0x1533   : > { %v4337_v6 = vmul.f32 0.03125, %v4333_v54  ;;  %v4344_v1 = vmul.f32 %v4340_v53, %v4340_v53 }
0x1535   : > { %v4341_v5 = vsub.f32 %v4321_v12, %v4337_v6  ;;  %v4352_v38 = vsel %vm531_vm0, %v4344_v1, 0.0  ;;  %v5088_v12 = vld [vmem:[%s6113_s27 + $0x78] sm:$0xff] }
0x1536   : > { %4353 = vadd.xlane.f32.xlu0 %v4352_v38  ;;  %5529 = vmatprep.subr.mxu0 %v5088_v12 }
0x1537   : > { %v4345_v9 = vmul.f32 %v4341_v5, %v4341_v5  ;;  %5530 = vmatpush3.msra.mxu0 %v5088_v12  ;;  %v4544_v12 = vrot.slane %v6345_v14, %v2507_v21 }
0x1538   : > { %5531 = vmatprep.subr.mxu0 %v5087_v34 }
0x1539   : > { %v4355_v8 = vsel %vm531_vm0, %v4345_v9, 0.0  ;;  %5532 = vmatpush3.msra.mxu0 %v5087_v34 }
0x153a   : > { %4356 = vadd.xlane.f32.xlu1 %v4355_v8  ;;  %5533 = vmatprep.subr.mxu0 %v5086_v11 }
0x153b   : > { %5534 = vmatpush3.msra.mxu0 %v5086_v11 }
0x153c   : > { %5535 = vmatprep.subr.mxu0 %v5085_v45 }
0x153d   : > { %5536 = vmatpush3.msra.mxu0 %v5085_v45 }
0x153e   : > { %5537 = vmatprep.subr.mxu0 %v5084_v40 }
0x153f   : > { %5538 = vmatpush3.msra.mxu0 %v5084_v40 }
0x1540   : > { %5539 = vmatprep.subr.mxu0 %v5083_v47 }
0x1541   : > { %5540 = vmatpush3.msra.mxu0 %v5083_v47 }
0x15b2   : > { %v4351_v59 = vpop.xlane.xlu1 %4350 }
0x15b3   : > { %v4359_v33 = vmul.f32 0.03125, %v4351_v59 }
0x15b4   : > { %v4348_v61 = vpop.xlane.xlu0 %4347 }
0x15b5   : > { %v4363_v63 = vadd.f32 1e-12, %v4359_v33  ;;  %v4358_v4 = vmul.f32 0.03125, %v4348_v61 }
0x15b7   : > { %5674 = vrsqrt.f32 %v4363_v63  ;;  %v4362_v7 = vadd.f32 1e-12, %v4358_v4 }
0x15b9   : > { %5676 = vrsqrt.f32 %v4362_v7 }
0x15bf   : > { %v4354_v24 = vpop.xlane.xlu0 %4353 }
0x15c0   : > { %v4360_v56 = vmul.f32 0.03125, %v4354_v24 }
0x15c2   : > { %v4364_v10 = vadd.f32 1e-12, %v4360_v56 }
0x15c3   : > { %v4357_v13 = vpop.xlane.xlu1 %4356 }
0x15c4   : > { %v5675_v16 = vpop.eup %5674  ;;  %5678 = vrsqrt.f32 %v4364_v10  ;;  %v4361_v19 = vmul.f32 0.03125, %v4357_v13 }
0x15c5   : > { %v4371_v29 = vmul.f32 %v5675_v16, %v4339_v22  ;;  %v5082_v22 = vld [vmem:[%s6113_s27 + $0x48] sm:$0xff] }
0x15c6   : > { %v5677_v30 = vpop.eup %5676  ;;  %v4365_v31 = vadd.f32 1e-12, %v4361_v19  ;;  %5541 = vmatprep.subr.mxu0 %v5082_v22 }
0x15c7   : > { %v4370_v32 = vmul.f32 %v5677_v30, %v4338_v49  ;;  %v4379_v36 = vmul.f32 %v4377_v27, %v4371_v29  ;;  %5542 = vmatpush3.msra.mxu0 %v5082_v22  ;;  %v4398_v49 = vrot.slane %v6345_v14, %v2362_v50 }
0x15c8   : > { %5680 = vrsqrt.f32 %v4365_v31  ;;  %5543 = vmatprep.subr.mxu0 %v5081_v25 }
0x15c9   : > { %v4378_v20 = vmul.f32 %v4377_v27, %v4370_v32  ;;  %v6377_v62 = vadd.f32 %v4385_v18, %v4379_v36  ;;  %5544 = vmatpush3.msra.mxu0 %v5081_v25 }
0x15cb   : > { %v6375_v37 = vadd.f32 %v4385_v18, %v4378_v20 }
0x15cd   : > { %5523 = vmatprep.mubr.msk.f32.mxu1 %vm531_vm0, %v6375_v37 }
0x15ce   : > { %5524 = vmatmul.mubr.msk.f32.vlgmr.msra.gmra.mxu1 %vm531_vm0, %v6377_v62 }
0x15d1   : > { %v5679_v48 = vpop.eup %5678 }
0x15d2   : > { %v4372_v46 = vmul.f32 %v5679_v48, %v4340_v53 }
0x15d4   : > { %v4380_v17 = vmul.f32 %v4377_v27, %v4372_v46 }
0x15d5   : > { %v5681_v41 = vpop.eup %5680 }
0x15d6   : > { %v6383_v23 = vadd.f32 %v4385_v18, %v4380_v17  ;;  %v4373_v28 = vmul.f32 %v5681_v41, %v4341_v5 }
0x15d8   : > { %5526 = vmatprep.mubr.msk.f32.mxu1 %vm531_vm0, %v6383_v23  ;;  %v4381_v42 = vmul.f32 %v4377_v27, %v4373_v28 }
0x15da   : > { %v6387_v43 = vadd.f32 %v4385_v18, %v4381_v42 }
0x15dc   : > { %5527 = vmatmul.mubr.msk.f32.gmra.mxu1 %vm531_vm0, %v6387_v43 }
0x15dd   : > { %5559 = vmatprep.mubr.msk.f32.mxu1 %vm5709_vm1, %v5708_v3 }
0x168e   : > { %v5525_v26 = vpop.f32.mrf.mxu1 }
0x168f   : > { %v4483_v2 = vadd.f32 %v5525_v26, %v4398_v49 }
0x1690   : > { %v4477_v51 = vpop.f32.mrf.mxu1 }
0x1691   : > { %v4497_v60 = vmul.f32 %v4483_v2, %v4483_v2  ;;  %v4478_v15 = vadd.f32 %v4477_v51, %v4398_v49 }
0x1693   : > { %v4501_v52 = vmul.f32 %v4497_v60, %v4483_v2  ;;  %v4496_v53 = vmul.f32 %v4478_v15, %v4478_v15 }
0x1695   : > { %v4505_v54 = vmul.f32 0.044715, %v4501_v52  ;;  %v4500_v6 = vmul.f32 %v4496_v53, %v4478_v15 }
0x1697   : > { %v4509_v1 = vadd.f32 %v4505_v54, %v4483_v2  ;;  %v4504_v5 = vmul.f32 0.044715, %v4500_v6 }
0x1699   : > { %v4513_v38 = vmul.f32 0.7978846, %v4509_v1  ;;  %v4508_v9 = vadd.f32 %v4504_v5, %v4478_v15 }
0x169b   : > { %5682 = vtanh.f32 %v4513_v38  ;;  %v4512_v8 = vmul.f32 0.7978846, %v4508_v9 }
0x169c   : > { %v5528_v55 = vpop.f32.mrf.mxu1 }
0x169d   : > { %5684 = vtanh.f32 %v4512_v8  ;;  %v4493_v57 = vadd.f32 %v5528_v55, %v4398_v49 }
0x169e   : > { %v4487_v58 = vpop.f32.mrf.mxu1 }
0x169f   : > { %v4499_v50 = vmul.f32 %v4493_v57, %v4493_v57  ;;  %v4488_v35 = vadd.f32 %v4487_v58, %v4398_v49 }
0x16a1   : > { %v4503_v59 = vmul.f32 %v4499_v50, %v4493_v57  ;;  %v4498_v33 = vmul.f32 %v4488_v35, %v4488_v35 }
0x16a3   : > { %v4507_v61 = vmul.f32 0.044715, %v4503_v59  ;;  %v4502_v63 = vmul.f32 %v4498_v33, %v4488_v35 }
0x16a5   : > { %v4511_v4 = vadd.f32 %v4507_v61, %v4493_v57  ;;  %v4506_v7 = vmul.f32 0.044715, %v4502_v63 }
0x16a7   : > { %v4515_v24 = vmul.f32 0.7978846, %v4511_v4  ;;  %v4510_v56 = vadd.f32 %v4506_v7, %v4488_v35 }
0x16a8   : > { %v5683_v10 = vpop.eup %5682 }
0x16a9   : > { %v4521_v13 = vadd.f32 1.0, %v5683_v10  ;;  %5686 = vtanh.f32 %v4515_v24  ;;  %v4514_v16 = vmul.f32 0.7978846, %v4510_v56 }
0x16aa   : > { %v5685_v19 = vpop.eup %5684 }
0x16ab   : > { %5688 = vtanh.f32 %v4514_v16  ;;  %v4520_v27 = vadd.f32 1.0, %v5685_v19  ;;  %v4525_v29 = vmul.f32 0.5, %v4521_v13 }
0x16ad   : > { %v4524_v30 = vmul.f32 0.5, %v4520_v27  ;;  %v4529_v32 = vmul.f32 %v4525_v29, %v4483_v2 }
0x16af   : > { %v4528_v31 = vmul.f32 %v4524_v30, %v4478_v15 }
0x16b1   : > { %5545 = vmatprep.mubr.msk.f32.mxu0 %vm2509_vm4, %v4528_v31  ;;  %v4701_v31 = vrot.slane %v6345_v14, %v2665_v39 }
0x16b2   : > { %5546 = vmatmul.mubr.msk.f32.vlgmr.msra.gmra.mxu0 %vm2509_vm4, %v4529_v32 }
0x16b6   : > { %v5687_v18 = vpop.eup %5686 }
0x16b7   : > { %v4523_v36 = vadd.f32 1.0, %v5687_v18 }
0x16b8   : > { %v5689_v20 = vpop.eup %5688 }
0x16b9   : > { %v4522_v48 = vadd.f32 1.0, %v5689_v20  ;;  %v4527_v46 = vmul.f32 0.5, %v4523_v36  ;;  %v4709_v36 = vrot.slane %v6345_v14, %v2673_v0  ;;  %v4714_v14 = vld [vmem:[%s488_s29] sm:$0xf] }
0x16bb   : > { %v4526_v17 = vmul.f32 0.5, %v4522_v48  ;;  %v4531_v28 = vmul.f32 %v4527_v46, %v4493_v57 }
0x16bd   : > { %v4530_v41 = vmul.f32 %v4526_v17, %v4488_v35 }
0x16bf   : > { %5548 = vmatprep.mubr.msk.f32.mxu0 %vm2509_vm4, %v4530_v41 }
0x16c0   : > { %5549 = vmatmul.mubr.msk.f32.gmra.mxu0 %vm2509_vm4, %v4531_v28 }
0x1772   : > { %v5547_v42 = vpop.f32.mrf.mxu0 }
0x1773   : > { %v4629_v45 = vadd.f32 %v5547_v42, %v4544_v12 }
0x1774   : > { %v4623_v34 = vpop.f32.mrf.mxu0 }
0x1775   : > { %v4624_v22 = vadd.f32 %v4623_v34, %v4544_v12  ;;  %v4643_v26 = vadd.f32 %v4629_v45, %v6377_v62 }
0x1777   : > { %v4642_v60 = vadd.f32 %v4624_v22, %v6375_v37  ;;  %v4649_v15 = vsel %vm531_vm0, %v4643_v26, 0.0 }
0x1779   : > { %v4646_v52 = vsel %vm531_vm0, %v4642_v60, 0.0 }
0x1780   : > { %v5550_v11 = vpop.f32.mrf.mxu0 }
0x1781   : > { %v4639_v40 = vadd.f32 %v5550_v11, %v4544_v12 }
0x1782   : > { %v4633_v47 = vpop.f32.mrf.mxu0 }
0x1783   : > { %v4645_v25 = vadd.f32 %v4639_v40, %v6387_v43  ;;  %v4634_v49 = vadd.f32 %v4633_v47, %v4544_v12 }
0x1785   : > { %v4644_v2 = vadd.f32 %v4634_v49, %v6383_v23  ;;  %v4655_v51 = vsel %vm531_vm0, %v4645_v25, 0.0 }
0x1786   : > { %4656 = vadd.xlane.f32.xlu0 %v4655_v51 }
0x1787   : > { %v4652_v21 = vsel %vm531_vm0, %v4644_v2, 0.0 }
0x1788   : > { %4653 = vadd.xlane.f32.xlu1 %v4652_v21 }
0x178a   : > { %4650 = vadd.xlane.f32.xlu0 %v4649_v15 }
0x178c   : > { %4647 = vadd.xlane.f32.xlu1 %v4646_v52 }
0x180f   : > { %v4657_v43 = vpop.xlane.xlu0 %4656 }
0x1810   : > { %v4661_v53 = vmul.f32 0.03125, %v4657_v43 }
0x1811   : > { %v4654_v54 = vpop.xlane.xlu1 %4653 }
0x1812   : > { %v4665_v62 = vsub.f32 %v4645_v25, %v4661_v53  ;;  %v4660_v6 = vmul.f32 0.03125, %v4654_v54 }
0x1813   : > { %v4651_v23 = vpop.xlane.xlu0 %4650 }
0x1814   : > { %v4664_v1 = vsub.f32 %v4644_v2, %v4660_v6  ;;  %v4659_v5 = vmul.f32 0.03125, %v4651_v23  ;;  %v4669_v38 = vmul.f32 %v4665_v62, %v4665_v62 }
0x1815   : > { %v4648_v9 = vpop.xlane.xlu1 %4647 }
0x1816   : > { %v4663_v37 = vsub.f32 %v4643_v26, %v4659_v5  ;;  %v4658_v8 = vmul.f32 0.03125, %v4648_v9  ;;  %v4679_v55 = vsel %vm531_vm0, %v4669_v38, 0.0  ;;  %v4668_v57 = vmul.f32 %v4664_v1, %v4664_v1 }
0x1817   : > { %4680 = vadd.xlane.f32.xlu0 %v4679_v55 }
0x1818   : > { %v4662_v58 = vsub.f32 %v4642_v60, %v4658_v8  ;;  %v4676_v50 = vsel %vm531_vm0, %v4668_v57, 0.0  ;;  %v4667_v35 = vmul.f32 %v4663_v37, %v4663_v37 }
0x1819   : > { %4677 = vadd.xlane.f32.xlu1 %v4676_v50 }
0x181a   : > { %v4673_v59 = vsel %vm531_vm0, %v4667_v35, 0.0  ;;  %v4666_v33 = vmul.f32 %v4662_v58, %v4662_v58 }
0x181b   : > { %4674 = vadd.xlane.f32.xlu0 %v4673_v59 }
0x181c   : > { %v4670_v61 = vsel %vm531_vm0, %v4666_v33, 0.0 }
0x181d   : > { %4671 = vadd.xlane.f32.xlu1 %v4670_v61 }
0x18a0   : > { %v4681_v63 = vpop.xlane.xlu0 %4680 }
0x18a1   : > { %v4685_v4 = vmul.f32 0.03125, %v4681_v63 }
0x18a2   : > { %v4678_v7 = vpop.xlane.xlu1 %4677 }
0x18a3   : > { %v4689_v24 = vadd.f32 1e-12, %v4685_v4  ;;  %v4684_v56 = vmul.f32 0.03125, %v4678_v7 }
0x18a4   : > { %v4675_v10 = vpop.xlane.xlu0 %4674 }
0x18a5   : > { %5690 = vrsqrt.f32 %v4689_v24  ;;  %v4688_v13 = vadd.f32 1e-12, %v4684_v56  ;;  %v4683_v16 = vmul.f32 0.03125, %v4675_v10 }
0x18a6   : > { %v4672_v19 = vpop.xlane.xlu1 %4671 }
0x18a7   : > { %5692 = vrsqrt.f32 %v4688_v13  ;;  %v4687_v27 = vadd.f32 1e-12, %v4683_v16  ;;  %v4682_v29 = vmul.f32 0.03125, %v4672_v19 }
0x18a9   : > { %5694 = vrsqrt.f32 %v4687_v27  ;;  %v4686_v30 = vadd.f32 1e-12, %v4682_v29 }
0x18ab   : > { %5696 = vrsqrt.f32 %v4686_v30 }
0x18b2   : > { %v5691_v32 = vpop.eup %5690 }
0x18b3   : > { %v4697_v18 = vmul.f32 %v5691_v32, %v4665_v62 }
0x18b4   : > { %v5693_v20 = vpop.eup %5692 }
0x18b5   : > { %v4705_v48 = vmul.f32 %v4701_v31, %v4697_v18  ;;  %v4696_v46 = vmul.f32 %v5693_v20, %v4664_v1 }
0x18b6   : > { %v5695_v17 = vpop.eup %5694 }
0x18b7   : > { %v4713_v41 = vadd.f32 %v4709_v36, %v4705_v48  ;;  %v4704_v28 = vmul.f32 %v4701_v31, %v4696_v46  ;;  %v4695_v42 = vmul.f32 %v5695_v17, %v4663_v37 }
0x18b8   : > { %v5697_v12 = vpop.eup %5696 }
0x18b9   : > { %5552 = vmatpush3.msra.mxu1 %v4713_v41  ;;  %v4712_v34 = vadd.f32 %v4709_v36, %v4704_v28  ;;  %v4703_v11 = vmul.f32 %v4701_v31, %v4695_v42  ;;  %v4694_v45 = vmul.f32 %v5697_v12, %v4662_v58 }
0x18ba   : > { %5553 = vmatprep.subr.mxu1 %v5708_v3 }
0x18bb   : > { %5554 = vmatpush3.msra.mxu1 %v4712_v34  ;;  %v4711_v44 = vadd.f32 %v4709_v36, %v4703_v11  ;;  %v4702_v39 = vmul.f32 %v4701_v31, %v4694_v45 }
0x18bc   : > { %5555 = vmatprep.subr.mxu1 %v5708_v3 }
0x18bd   : > { %5556 = vmatpush3.msra.mxu1 %v4711_v44  ;;  %v4710_v0 = vadd.f32 %v4709_v36, %v4702_v39 }
0x18be   : > { %5557 = vmatprep.subr.mxu1 %v5708_v3 }
0x18bf   : > { %5558 = vmatpush3.msra.mxu1 %v4710_v0 }
0x18c0   : > { %5560 = vmatmul.mubr.msk.f32.vlgmr.msra.gmra.mxu1 %vm531_vm0, %v4714_v14 }
0x1980   : > { %v4784_v40 = vpop.f32.mrf.mxu1 }
0x1981   : > { %v4788_v47 = vmul.f32 %v4784_v40, %v4784_v40 }
0x1982   : > { %v5561_v22 = vpop.f32.mrf.mxu1 }
0x1983   : > { %v4790_v25 = vsel %vm4789_vm5, %v4788_v47, 0.0 }
0x1984   : > { %4791 = vadd.xlane.f32.xlu0 %v4790_v25 }
0x1a0d   : > { %v4792_v49 = vpop.xlane.xlu0 %4791 }
0x1a0e   : > { %v4793_v26 = vmax.f32 %v4792_v49, 1e-24 }
0x1a10   : > { %5698 = vrsqrt.f32 %v4793_v26 }
0x1a1d   : > { %v5699_v2 = vpop.eup %5698 }
0x1a1e   : > { %v4795_v51 = vmul.f32 %v5699_v2, %v4784_v40 }
0x1a20   : > { %4796 = vst.msk [vmem:[%s525_s18] sm:$0xf] %vm4789_vm5, %v4795_v51 }
0x1a21 PF: > { %s20_s13 = sadd.s32 1, %s5706_s13  }
0x1a22   : > { %p17_p4 = scmp.ge.s32.totalorder %s20_s13, 4  }
0x1a24   :  { %19 = sbr.rel (!%p17_p4) target bundleno = 1 (0x1), region = 123 }

</bundles_post_ra>
